<compile_context>
chip_gen: v7x
topology: tpu7x:2x2x1
jax: 0.10.0
libtpu: 0.0.40
codegen_flags: <defaults>
</compile_context>

<pallas_src>
import functools

import jax
import jax.numpy as jnp
from jax.experimental import pallas as pl
from jax.experimental.pallas import tpu as pltpu

EPS = 1e-3   # torch.nn.SyncBatchNorm(out_channels, eps=0.001)
LANE = 128


def _round_up(x, m):
    return (x + m - 1) // m * m


def _conv_stats_kernel(xc_ref, xh_ref, w_ref, y_ref, st_ref, xs_ref):
    """3x3 conv (stride 1) on one (batch, row-tile) block + partial BN stats.

    xc_ref: (1, TH, W+2, Cin)    center rows of the W-padded input
    xh_ref: (1, 1, 2, W+2, Cin)  halo rows (row above tile, row below tile)
    w_ref:  (9, Cin, Cout)       conv taps in (dy, dx) row-major order
    y_ref:  (1, TH, W, Cout)     conv output tile (lane-dense Cout)
    st_ref: (1, 1, 2, Cout)      per-tile [sum, sum-of-squares]
    xs_ref: (TH+2, W+2, Cin)     VMEM scratch: assembled haloed input slab
    """
    TH = xc_ref.shape[1]
    W = y_ref.shape[2]
    Cout = y_ref.shape[3]

    # Assemble the haloed slab in VMEM scratch (one tile-sized VMEM copy).
    xs_ref[0] = xh_ref[0, 0, 0]
    xs_ref[1:TH + 1] = xc_ref[0]
    xs_ref[TH + 1] = xh_ref[0, 0, 1]

    # 9 shifted channel contractions on the MXU; operands stay in their input
    # dtype (native bf16 path), accumulation in f32 via preferred_element_type.
    # TODO(synk): for very small true Cin an im2col slab with K=9*Cin would
    #             feed the 256-deep MXU better; channel padding to 128 already
    #             gives a reasonable contraction depth here.
    acc = jnp.zeros((TH, W, Cout), jnp.float32)
    for dy in range(3):
        for dx in range(3):
            xs = xs_ref[dy:dy + TH, dx:dx + W, :]
            acc = acc + jax.lax.dot_general(
                xs, w_ref[dy * 3 + dx],
                dimension_numbers=(((2,), (0,)), ((), ())),
                preferred_element_type=jnp.float32)

    y_ref[0] = acc.astype(y_ref.dtype)

    # Per-tile partial statistics; combined by a tiny XLA reduce outside.
    acc2d = acc.reshape(TH * W, Cout)
    ssum = jnp.sum(acc2d, axis=0, keepdims=True)
    ssq = jnp.sum(acc2d * acc2d, axis=0, keepdims=True)
    st_ref[0, 0] = jnp.concatenate([ssum, ssq], axis=0)


def _bn_relu_kernel(y_ref, scale_ref, shift_ref, o_ref):
    """Mem-bound normalize + ReLU with folded affine: max(y*scale + shift, 0)."""
    y = y_ref[...].astype(jnp.float32)
    o = jnp.maximum(y * scale_ref[...] + shift_ref[...], 0.0)
    o_ref[...] = o.astype(o_ref.dtype)


@functools.partial(jax.jit, static_argnames=("upsample", "downsample", "tile_h"))
def conv3x3_gn_relu(x_nchw, weight_oihw, gamma, beta,
                    upsample=False, downsample=False, tile_h=8):
    """Pallas port of Conv3x3GNReLU.forward for the default constructor flags."""
    # TODO(synk): upsample (bilinear x2, align_corners=True) and downsample
    #             (MaxPool2d k=4 s=4) branches are not implemented (constructor
    #             defaults are False).
    assert not upsample and not downsample
    # TODO(synk): SyncBatchNorm cross-replica statistic reduction and the
    #             running_mean/running_var updates are not modeled; this is the
    #             single-device training-mode forward.

    N, Cin, H, W = x_nchw.shape
    Cout = weight_oihw.shape[0]
    dtype = x_nchw.dtype

    # Lane-dense channel padding (last dim maps to the 128-wide lane axis).
    cin_p = _round_up(Cin, LANE)
    cout_p = _round_up(Cout, LANE)

    if H % tile_h:           # tile_h must divide H for this simple tiling
        tile_h = H
    nt = H // tile_h
    wp = W + 2

    # NCHW -> NHWC, pad W by 1 (conv padding=1) and channels up to cin_p.
    x = jnp.transpose(x_nchw, (0, 2, 3, 1))
    x = jnp.pad(x, ((0, 0), (0, 0), (1, 1), (0, cin_p - Cin)))      # (N,H,Wp,cin_p)

    # Two halo rows per row-tile (zeros at the image borders) so every grid
    # block stays Blocked — no overlapping windows, no full-H pad round trip.
    xz = jnp.pad(x, ((0, 0), (1, 1), (0, 0), (0, 0)))               # (N,H+2,Wp,cin_p)
    t0 = jnp.arange(nt) * tile_h
    halo = jnp.stack([xz[:, t0], xz[:, t0 + tile_h + 1]], axis=2)   # (N,nt,2,Wp,cin_p)

    # (Cout, Cin, 3, 3) -> (9, cin_p, cout_p), taps in (dy, dx) row-major order.
    w = jnp.pad(weight_oihw,
                ((0, cout_p - Cout), (0, cin_p - Cin), (0, 0), (0, 0)))
    w = jnp.transpose(w, (2, 3, 1, 0)).reshape(9, cin_p, cout_p)

    cparams = pltpu.CompilerParams(
        dimension_semantics=("parallel", "parallel"),
        vmem_limit_bytes=64 * 1024 * 1024)

    # ---- pass 1: conv + per-tile partial stats ------------------------------
    y_conv, stats = pl.pallas_call(
        _conv_stats_kernel,
        grid=(N, nt),
        in_specs=[
            pl.BlockSpec((1, tile_h, wp, cin_p), lambda n, t: (n, t, 0, 0)),
            pl.BlockSpec((1, 1, 2, wp, cin_p), lambda n, t: (n, t, 0, 0, 0)),
            pl.BlockSpec((9, cin_p, cout_p), lambda n, t: (0, 0, 0)),
        ],
        out_specs=(
            pl.BlockSpec((1, tile_h, W, cout_p), lambda n, t: (n, t, 0, 0)),
            pl.BlockSpec((1, 1, 2, cout_p), lambda n, t: (n, t, 0, 0)),
        ),
        out_shape=(
            jax.ShapeDtypeStruct((N, H, W, cout_p), dtype),
            jax.ShapeDtypeStruct((N, nt, 2, cout_p), jnp.float32),
        ),
        scratch_shapes=[pltpu.VMEM((tile_h + 2, wp, cin_p), dtype)],
        compiler_params=cparams,
    )(x, halo, w)

    # ---- tiny XLA reduce: batch statistics -> folded scale / shift ----------
    cnt = jnp.float32(N * H * W)
    ssum = jnp.sum(stats[:, :, 0, :], axis=(0, 1))
    ssq = jnp.sum(stats[:, :, 1, :], axis=(0, 1))
    mean = ssum / cnt
    var = jnp.maximum(ssq / cnt - mean * mean, 0.0)   # biased batch variance
    inv = jax.lax.rsqrt(var + jnp.float32(EPS))
    gamma_p = jnp.pad(gamma.astype(jnp.float32), (0, cout_p - Cout),
                      constant_values=1.0)
    beta_p = jnp.pad(beta.astype(jnp.float32), (0, cout_p - Cout))
    scale = (gamma_p * inv).reshape(1, cout_p)
    shift = (beta_p - mean * gamma_p * inv).reshape(1, cout_p)

    # ---- pass 2: mem-bound normalize + ReLU ---------------------------------
    out_nhwc = pl.pallas_call(
        _bn_relu_kernel,
        grid=(N, nt),
        in_specs=[
            pl.BlockSpec((1, tile_h, W, cout_p), lambda n, t: (n, t, 0, 0)),
            pl.BlockSpec((1, cout_p), lambda n, t: (0, 0)),
            pl.BlockSpec((1, cout_p), lambda n, t: (0, 0)),
        ],
        out_specs=pl.BlockSpec((1, tile_h, W, cout_p), lambda n, t: (n, t, 0, 0)),
        out_shape=jax.ShapeDtypeStruct((N, H, W, cout_p), dtype),
        compiler_params=cparams,
    )(y_conv, scale, shift)

    # Drop channel padding, back to PyTorch NCHW layout.
    return jnp.transpose(out_nhwc[..., :Cout], (0, 3, 1, 2))


def _reference(x_nchw, weight_oihw, gamma, beta):
    """Pure-JAX reference (conv + training-mode BN + ReLU) in NCHW."""
    y = jax.lax.conv_general_dilated(
        x_nchw, weight_oihw, window_strides=(1, 1),
        padding=((1, 1), (1, 1)),
        dimension_numbers=("NCHW", "OIHW", "NCHW"))
    mean = jnp.mean(y, axis=(0, 2, 3), keepdims=True)
    var = jnp.mean((y - mean) ** 2, axis=(0, 2, 3), keepdims=True)
    yn = (y - mean) * jax.lax.rsqrt(var + EPS)
    yn = yn * gamma.reshape(1, -1, 1, 1) + beta.reshape(1, -1, 1, 1)
    return jnp.maximum(yn, 0.0)


if __name__ == "__main__":
    key = jax.random.PRNGKey(0)
    k_x, k_w, k_g, k_b = jax.random.split(key, 4)

    N, Cin, H, W = 2, 4, 16, 16
    Cout = 8

    x = jax.random.normal(k_x, (N, Cin, H, W), dtype=jnp.float32)
    weight = 0.1 * jax.random.normal(k_w, (Cout, Cin, 3, 3), dtype=jnp.float32)
    # Non-trivial BN affine params to exercise the folded scale/shift path.
    gamma = 1.0 + 0.1 * jax.random.normal(k_g, (Cout,), dtype=jnp.float32)
    beta = 0.1 * jax.random.normal(k_b, (Cout,), dtype=jnp.float32)

    out = conv3x3_gn_relu(x, weight, gamma, beta)
    out = jax.block_until_ready(out)

    ref = _reference(x, weight, gamma, beta)
    assert out.shape == (N, Cout, H, W), out.shape
    err = float(jnp.max(jnp.abs(out - ref)))
    assert jnp.allclose(out, ref, atol=1e-2, rtol=1e-2), err

    print("KERNEL_OK")
</pallas_src>

<mosaic_0001>
module attributes {stable_mosaic.version = 11 : i64} {
  func.func @_bn_relu_kernel(%arg0: i32, %arg1: i32, %arg2: memref<1x8x16x128xf32, #tpu.memory_space<vmem>>, %arg3: memref<1x128xf32, #tpu.memory_space<vmem>>, %arg4: memref<1x128xf32, #tpu.memory_space<vmem>>, %arg5: memref<1x8x16x128xf32, #tpu.memory_space<vmem>>) attributes {dimension_semantics = [#tpu.dimension_semantics<parallel>, #tpu.dimension_semantics<parallel>], iteration_bounds = array<i64: 2, 2>, scalar_prefetch = 0 : i64, scratch_operands = 0 : i64, tpu.core_type = #tpu.core_type<tc>, window_params = [{transform_indices = @transform_0, window_bounds = array<i64: 1, 8, 16, 128>}, {pipeline_mode = #tpu.pipeline_mode<synchronous>, transform_indices = @transform_1, window_bounds = array<i64: 1, 128>}, {pipeline_mode = #tpu.pipeline_mode<synchronous>, transform_indices = @transform_2, window_bounds = array<i64: 1, 128>}, {transform_indices = @transform_3, window_bounds = array<i64: 1, 8, 16, 128>}]} {
    %c0 = arith.constant 0 : index
    %c0_0 = arith.constant 0 : index
    %c0_1 = arith.constant 0 : index
    %c0_2 = arith.constant 0 : index
    %0 = vector.load %arg2[%c0, %c0_0, %c0_1, %c0_2] : memref<1x8x16x128xf32, #tpu.memory_space<vmem>>, vector<1x8x16x128xf32>
    %c0_3 = arith.constant 0 : index
    %c0_4 = arith.constant 0 : index
    %1 = vector.load %arg3[%c0_3, %c0_4] : memref<1x128xf32, #tpu.memory_space<vmem>>, vector<1x128xf32>
    %2 = vector.shape_cast %1 : vector<1x128xf32> to vector<1x1x1x128xf32>
    %3 = vector.broadcast %2 : vector<1x1x1x128xf32> to vector<1x8x16x128xf32>
    %4 = arith.mulf %0, %3 : vector<1x8x16x128xf32>
    %c0_5 = arith.constant 0 : index
    %c0_6 = arith.constant 0 : index
    %5 = vector.load %arg4[%c0_5, %c0_6] : memref<1x128xf32, #tpu.memory_space<vmem>>, vector<1x128xf32>
    %6 = vector.shape_cast %5 : vector<1x128xf32> to vector<1x1x1x128xf32>
    %7 = vector.broadcast %6 : vector<1x1x1x128xf32> to vector<1x8x16x128xf32>
    %8 = arith.addf %4, %7 : vector<1x8x16x128xf32>
    %cst = arith.constant 0.000000e+00 : f32
    %9 = vector.broadcast %cst : f32 to vector<1x8x16x128xf32>
    %10 = arith.maximumf %8, %9 : vector<1x8x16x128xf32>
    %c0_7 = arith.constant 0 : index
    %c0_8 = arith.constant 0 : index
    %c0_9 = arith.constant 0 : index
    %c0_10 = arith.constant 0 : index
    %11 = vector.load %arg5[%c0_7, %c0_8, %c0_9, %c0_10] : memref<1x8x16x128xf32, #tpu.memory_space<vmem>>, vector<1x8x16x128xf32>
    tpu.vector_store %arg5[%c0_7, %c0_8, %c0_9, %c0_10], %10 {strides = array<i32>} : memref<1x8x16x128xf32, #tpu.memory_space<vmem>>, vector<1x8x16x128xf32>,
    return
  }
  func.func @transform_0(%arg0: i32, %arg1: i32) -> (i32, i32, i32, i32) {
    %c0_i32 = arith.constant 0 : i32
    %c0_i32_0 = arith.constant 0 : i32
    %c0_i32_1 = arith.constant 0 : i32
    return %arg0, %arg1, %c0_i32, %c0_i32_0 : i32, i32, i32, i32
  }
  func.func @transform_1(%arg0: i32, %arg1: i32) -> (i32, i32) {
    %c0_i32 = arith.constant 0 : i32
    %c0_i32_0 = arith.constant 0 : i32
    %c0_i32_1 = arith.constant 0 : i32
    return %c0_i32, %c0_i32_0 : i32, i32
  }
  func.func @transform_2(%arg0: i32, %arg1: i32) -> (i32, i32) {
    %c0_i32 = arith.constant 0 : i32
    %c0_i32_0 = arith.constant 0 : i32
    %c0_i32_1 = arith.constant 0 : i32
    return %c0_i32, %c0_i32_0 : i32, i32
  }
  func.func @transform_3(%arg0: i32, %arg1: i32) -> (i32, i32, i32, i32) {
    %c0_i32 = arith.constant 0 : i32
    %c0_i32_0 = arith.constant 0 : i32
    %c0_i32_1 = arith.constant 0 : i32
    return %arg0, %arg1, %c0_i32, %c0_i32_0 : i32, i32, i32, i32
  }
}

module attributes {stable_mosaic.version = 11 : i64} {
  func.func @_conv_stats_kernel(%arg0: i32, %arg1: i32, %arg2: memref<1x8x18x128xf32, #tpu.memory_space<vmem>>, %arg3: memref<1x1x2x18x128xf32, #tpu.memory_space<vmem>>, %arg4: memref<9x128x128xf32, #tpu.memory_space<vmem>>, %arg5: memref<1x8x16x128xf32, #tpu.memory_space<vmem>>, %arg6: memref<1x1x2x128xf32, #tpu.memory_space<vmem>>, %arg7: memref<10x18x128xf32, #tpu.memory_space<vmem>>) attributes {dimension_semantics = [#tpu.dimension_semantics<parallel>, #tpu.dimension_semantics<parallel>], iteration_bounds = array<i64: 2, 2>, scalar_prefetch = 0 : i64, scratch_operands = 1 : i64, tpu.core_type = #tpu.core_type<tc>, window_params = [{transform_indices = @transform_0, window_bounds = array<i64: 1, 8, 18, 128>}, {transform_indices = @transform_1, window_bounds = array<i64: 1, 1, 2, 18, 128>}, {pipeline_mode = #tpu.pipeline_mode<synchronous>, transform_indices = @transform_2, window_bounds = array<i64: 9, 128, 128>}, {transform_indices = @transform_3, window_bounds = array<i64: 1, 8, 16, 128>}, {transform_indices = @transform_4, window_bounds = array<i64: 1, 1, 2, 128>}]} {
    %c0 = arith.constant 0 : index
    %c0_0 = arith.constant 0 : index
    %c0_1 = arith.constant 0 : index
    %c0_2 = arith.constant 0 : index
    %c0_3 = arith.constant 0 : index
    %0 = vector.load %arg3[%c0, %c0_0, %c0_1, %c0_2, %c0_3] : memref<1x1x2x18x128xf32, #tpu.memory_space<vmem>>, vector<1x1x1x18x128xf32>
    %1 = vector.shape_cast %0 : vector<1x1x1x18x128xf32> to vector<18x128xf32>
    %c0_4 = arith.constant 0 : index
    %c0_5 = arith.constant 0 : index
    %c0_6 = arith.constant 0 : index
    %2 = vector.load %arg7[%c0_4, %c0_5, %c0_6] : memref<10x18x128xf32, #tpu.memory_space<vmem>>, vector<1x18x128xf32>
    %3 = vector.shape_cast %2 : vector<1x18x128xf32> to vector<18x128xf32>
    %4 = vector.shape_cast %1 : vector<18x128xf32> to vector<1x18x128xf32>
    tpu.vector_store %arg7[%c0_4, %c0_5, %c0_6], %4 {strides = array<i32>} : memref<10x18x128xf32, #tpu.memory_space<vmem>>, vector<1x18x128xf32>,
    %c0_7 = arith.constant 0 : index
    %c0_8 = arith.constant 0 : index
    %c0_9 = arith.constant 0 : index
    %c0_10 = arith.constant 0 : index
    %5 = vector.load %arg2[%c0_7, %c0_8, %c0_9, %c0_10] : memref<1x8x18x128xf32, #tpu.memory_space<vmem>>, vector<1x8x18x128xf32>
    %6 = vector.shape_cast %5 : vector<1x8x18x128xf32> to vector<8x18x128xf32>
    %c1 = arith.constant 1 : index
    %c0_11 = arith.constant 0 : index
    %c0_12 = arith.constant 0 : index
    %7 = vector.load %arg7[%c1, %c0_11, %c0_12] : memref<10x18x128xf32, #tpu.memory_space<vmem>>, vector<8x18x128xf32>
    tpu.vector_store %arg7[%c1, %c0_11, %c0_12], %6 {strides = array<i32>} : memref<10x18x128xf32, #tpu.memory_space<vmem>>, vector<8x18x128xf32>,
    %c0_13 = arith.constant 0 : index
    %c0_14 = arith.constant 0 : index
    %c1_15 = arith.constant 1 : index
    %c0_16 = arith.constant 0 : index
    %c0_17 = arith.constant 0 : index
    %8 = vector.load %arg3[%c0_13, %c0_14, %c1_15, %c0_16, %c0_17] : memref<1x1x2x18x128xf32, #tpu.memory_space<vmem>>, vector<1x1x1x18x128xf32>
    %9 = vector.shape_cast %8 : vector<1x1x1x18x128xf32> to vector<18x128xf32>
    %c9 = arith.constant 9 : index
    %c0_18 = arith.constant 0 : index
    %c0_19 = arith.constant 0 : index
    %10 = vector.load %arg7[%c9, %c0_18, %c0_19] : memref<10x18x128xf32, #tpu.memory_space<vmem>>, vector<1x18x128xf32>
    %11 = vector.shape_cast %10 : vector<1x18x128xf32> to vector<18x128xf32>
    %12 = vector.shape_cast %9 : vector<18x128xf32> to vector<1x18x128xf32>
    tpu.vector_store %arg7[%c9, %c0_18, %c0_19], %12 {strides = array<i32>} : memref<10x18x128xf32, #tpu.memory_space<vmem>>, vector<1x18x128xf32>,
    %cst = arith.constant 0.000000e+00 : f32
    %13 = vector.broadcast %cst : f32 to vector<8x16x128xf32>
    %c0_20 = arith.constant 0 : index
    %c0_21 = arith.constant 0 : index
    %c0_22 = arith.constant 0 : index
    %14 = vector.load %arg7[%c0_20, %c0_21, %c0_22] : memref<10x18x128xf32, #tpu.memory_space<vmem>>, vector<8x16x128xf32>
    %c0_23 = arith.constant 0 : index
    %c0_24 = arith.constant 0 : index
    %c0_25 = arith.constant 0 : index
    %15 = vector.load %arg4[%c0_23, %c0_24, %c0_25] : memref<9x128x128xf32, #tpu.memory_space<vmem>>, vector<1x128x128xf32>
    %16 = vector.shape_cast %15 : vector<1x128x128xf32> to vector<128x128xf32>
    %cst_26 = arith.constant dense<0.000000e+00> : vector<8x16x128xf32>
    %17 = tpu.matmul %14, %16, %cst_26 {dimension_numbers = #tpu.dot_dimension_numbers<[2], [0], [0, 1], [1], [0, 0, 0, 1, 1, 1], [], []>} : vector<8x16x128xf32>, vector<128x128xf32>, vector<8x16x128xf32> -> vector<8x16x128xf32>
    %18 = arith.addf %13, %17 : vector<8x16x128xf32>
    %c0_27 = arith.constant 0 : index
    %c1_28 = arith.constant 1 : index
    %c0_29 = arith.constant 0 : index
    %19 = vector.load %arg7[%c0_27, %c1_28, %c0_29] : memref<10x18x128xf32, #tpu.memory_space<vmem>>, vector<8x16x128xf32>
    %c1_30 = arith.constant 1 : index
    %c0_31 = arith.constant 0 : index
    %c0_32 = arith.constant 0 : index
    %20 = vector.load %arg4[%c1_30, %c0_31, %c0_32] : memref<9x128x128xf32, #tpu.memory_space<vmem>>, vector<1x128x128xf32>
    %21 = vector.shape_cast %20 : vector<1x128x128xf32> to vector<128x128xf32>
    %cst_33 = arith.constant dense<0.000000e+00> : vector<8x16x128xf32>
    %22 = tpu.matmul %19, %21, %cst_33 {dimension_numbers = #tpu.dot_dimension_numbers<[2], [0], [0, 1], [1], [0, 0, 0, 1, 1, 1], [], []>} : vector<8x16x128xf32>, vector<128x128xf32>, vector<8x16x128xf32> -> vector<8x16x128xf32>
    %23 = arith.addf %18, %22 : vector<8x16x128xf32>
    %c0_34 = arith.constant 0 : index
    %c2 = arith.constant 2 : index
    %c0_35 = arith.constant 0 : index
    %24 = vector.load %arg7[%c0_34, %c2, %c0_35] : memref<10x18x128xf32, #tpu.memory_space<vmem>>, vector<8x16x128xf32>
    %c2_36 = arith.constant 2 : index
    %c0_37 = arith.constant 0 : index
    %c0_38 = arith.constant 0 : index
    %25 = vector.load %arg4[%c2_36, %c0_37, %c0_38] : memref<9x128x128xf32, #tpu.memory_space<vmem>>, vector<1x128x128xf32>
    %26 = vector.shape_cast %25 : vector<1x128x128xf32> to vector<128x128xf32>
    %cst_39 = arith.constant dense<0.000000e+00> : vector<8x16x128xf32>
    %27 = tpu.matmul %24, %26, %cst_39 {dimension_numbers = #tpu.dot_dimension_numbers<[2], [0], [0, 1], [1], [0, 0, 0, 1, 1, 1], [], []>} : vector<8x16x128xf32>, vector<128x128xf32>, vector<8x16x128xf32> -> vector<8x16x128xf32>
    %28 = arith.addf %23, %27 : vector<8x16x128xf32>
    %c1_40 = arith.constant 1 : index
    %c0_41 = arith.constant 0 : index
    %c0_42 = arith.constant 0 : index
    %29 = vector.load %arg7[%c1_40, %c0_41, %c0_42] : memref<10x18x128xf32, #tpu.memory_space<vmem>>, vector<8x16x128xf32>
    %c3 = arith.constant 3 : index
    %c0_43 = arith.constant 0 : index
    %c0_44 = arith.constant 0 : index
    %30 = vector.load %arg4[%c3, %c0_43, %c0_44] : memref<9x128x128xf32, #tpu.memory_space<vmem>>, vector<1x128x128xf32>
    %31 = vector.shape_cast %30 : vector<1x128x128xf32> to vector<128x128xf32>
    %cst_45 = arith.constant dense<0.000000e+00> : vector<8x16x128xf32>
    %32 = tpu.matmul %29, %31, %cst_45 {dimension_numbers = #tpu.dot_dimension_numbers<[2], [0], [0, 1], [1], [0, 0, 0, 1, 1, 1], [], []>} : vector<8x16x128xf32>, vector<128x128xf32>, vector<8x16x128xf32> -> vector<8x16x128xf32>
    %33 = arith.addf %28, %32 : vector<8x16x128xf32>
    %c1_46 = arith.constant 1 : index
    %c1_47 = arith.constant 1 : index
    %c0_48 = arith.constant 0 : index
    %34 = vector.load %arg7[%c1_46, %c1_47, %c0_48] : memref<10x18x128xf32, #tpu.memory_space<vmem>>, vector<8x16x128xf32>
    %c4 = arith.constant 4 : index
    %c0_49 = arith.constant 0 : index
    %c0_50 = arith.constant 0 : index
    %35 = vector.load %arg4[%c4, %c0_49, %c0_50] : memref<9x128x128xf32, #tpu.memory_space<vmem>>, vector<1x128x128xf32>
    %36 = vector.shape_cast %35 : vector<1x128x128xf32> to vector<128x128xf32>
    %cst_51 = arith.constant dense<0.000000e+00> : vector<8x16x128xf32>
    %37 = tpu.matmul %34, %36, %cst_51 {dimension_numbers = #tpu.dot_dimension_numbers<[2], [0], [0, 1], [1], [0, 0, 0, 1, 1, 1], [], []>} : vector<8x16x128xf32>, vector<128x128xf32>, vector<8x16x128xf32> -> vector<8x16x128xf32>
    %38 = arith.addf %33, %37 : vector<8x16x128xf32>
    %c1_52 = arith.constant 1 : index
    %c2_53 = arith.constant 2 : index
    %c0_54 = arith.constant 0 : index
    %39 = vector.load %arg7[%c1_52, %c2_53, %c0_54] : memref<10x18x128xf32, #tpu.memory_space<vmem>>, vector<8x16x128xf32>
    %c5 = arith.constant 5 : index
    %c0_55 = arith.constant 0 : index
    %c0_56 = arith.constant 0 : index
    %40 = vector.load %arg4[%c5, %c0_55, %c0_56] : memref<9x128x128xf32, #tpu.memory_space<vmem>>, vector<1x128x128xf32>
    %41 = vector.shape_cast %40 : vector<1x128x128xf32> to vector<128x128xf32>
    %cst_57 = arith.constant dense<0.000000e+00> : vector<8x16x128xf32>
    %42 = tpu.matmul %39, %41, %cst_57 {dimension_numbers = #tpu.dot_dimension_numbers<[2], [0], [0, 1], [1], [0, 0, 0, 1, 1, 1], [], []>} : vector<8x16x128xf32>, vector<128x128xf32>, vector<8x16x128xf32> -> vector<8x16x128xf32>
    %43 = arith.addf %38, %42 : vector<8x16x128xf32>
    %c2_58 = arith.constant 2 : index
    %c0_59 = arith.constant 0 : index
    %c0_60 = arith.constant 0 : index
    %44 = vector.load %arg7[%c2_58, %c0_59, %c0_60] : memref<10x18x128xf32, #tpu.memory_space<vmem>>, vector<8x16x128xf32>
    %c6 = arith.constant 6 : index
    %c0_61 = arith.constant 0 : index
    %c0_62 = arith.constant 0 : index
    %45 = vector.load %arg4[%c6, %c0_61, %c0_62] : memref<9x128x128xf32, #tpu.memory_space<vmem>>, vector<1x128x128xf32>
    %46 = vector.shape_cast %45 : vector<1x128x128xf32> to vector<128x128xf32>
    %cst_63 = arith.constant dense<0.000000e+00> : vector<8x16x128xf32>
    %47 = tpu.matmul %44, %46, %cst_63 {dimension_numbers = #tpu.dot_dimension_numbers<[2], [0], [0, 1], [1], [0, 0, 0, 1, 1, 1], [], []>} : vector<8x16x128xf32>, vector<128x128xf32>, vector<8x16x128xf32> -> vector<8x16x128xf32>
    %48 = arith.addf %43, %47 : vector<8x16x128xf32>
    %c2_64 = arith.constant 2 : index
    %c1_65 = arith.constant 1 : index
    %c0_66 = arith.constant 0 : index
    %49 = vector.load %arg7[%c2_64, %c1_65, %c0_66] : memref<10x18x128xf32, #tpu.memory_space<vmem>>, vector<8x16x128xf32>
    %c7 = arith.constant 7 : index
    %c0_67 = arith.constant 0 : index
    %c0_68 = arith.constant 0 : index
    %50 = vector.load %arg4[%c7, %c0_67, %c0_68] : memref<9x128x128xf32, #tpu.memory_space<vmem>>, vector<1x128x128xf32>
    %51 = vector.shape_cast %50 : vector<1x128x128xf32> to vector<128x128xf32>
    %cst_69 = arith.constant dense<0.000000e+00> : vector<8x16x128xf32>
    %52 = tpu.matmul %49, %51, %cst_69 {dimension_numbers = #tpu.dot_dimension_numbers<[2], [0], [0, 1], [1], [0, 0, 0, 1, 1, 1], [], []>} : vector<8x16x128xf32>, vector<128x128xf32>, vector<8x16x128xf32> -> vector<8x16x128xf32>
    %53 = arith.addf %48, %52 : vector<8x16x128xf32>
    %c2_70 = arith.constant 2 : index
    %c2_71 = arith.constant 2 : index
    %c0_72 = arith.constant 0 : index
    %54 = vector.load %arg7[%c2_70, %c2_71, %c0_72] : memref<10x18x128xf32, #tpu.memory_space<vmem>>, vector<8x16x128xf32>
    %c8 = arith.constant 8 : index
    %c0_73 = arith.constant 0 : index
    %c0_74 = arith.constant 0 : index
    %55 = vector.load %arg4[%c8, %c0_73, %c0_74] : memref<9x128x128xf32, #tpu.memory_space<vmem>>, vector<1x128x128xf32>
    %56 = vector.shape_cast %55 : vector<1x128x128xf32> to vector<128x128xf32>
    %cst_75 = arith.constant dense<0.000000e+00> : vector<8x16x128xf32>
    %57 = tpu.matmul %54, %56, %cst_75 {dimension_numbers = #tpu.dot_dimension_numbers<[2], [0], [0, 1], [1], [0, 0, 0, 1, 1, 1], [], []>} : vector<8x16x128xf32>, vector<128x128xf32>, vector<8x16x128xf32> -> vector<8x16x128xf32>
    %58 = arith.addf %53, %57 : vector<8x16x128xf32>
    %c0_76 = arith.constant 0 : index
    %c0_77 = arith.constant 0 : index
    %c0_78 = arith.constant 0 : index
    %c0_79 = arith.constant 0 : index
    %59 = vector.load %arg5[%c0_76, %c0_77, %c0_78, %c0_79] : memref<1x8x16x128xf32, #tpu.memory_space<vmem>>, vector<1x8x16x128xf32>
    %60 = vector.shape_cast %59 : vector<1x8x16x128xf32> to vector<8x16x128xf32>
    %61 = vector.shape_cast %58 : vector<8x16x128xf32> to vector<1x8x16x128xf32>
    tpu.vector_store %arg5[%c0_76, %c0_77, %c0_78, %c0_79], %61 {strides = array<i32>} : memref<1x8x16x128xf32, #tpu.memory_space<vmem>>, vector<1x8x16x128xf32>,
    %62 = vector.shape_cast %58 : vector<8x16x128xf32> to vector<128x128xf32>
    %cst_80 = arith.constant dense<0.000000e+00> : vector<128xf32>
    %63 = vector.multi_reduction <add>, %62, %cst_80 [0] : vector<128x128xf32> to vector<128xf32>
    %64 = vector.shape_cast %63 : vector<128xf32> to vector<1x128xf32>
    %65 = arith.mulf %62, %62 : vector<128x128xf32>
    %cst_81 = arith.constant dense<0.000000e+00> : vector<128xf32>
    %66 = vector.multi_reduction <add>, %65, %cst_81 [0] : vector<128x128xf32> to vector<128xf32>
    %67 = vector.shape_cast %66 : vector<128xf32> to vector<1x128xf32>
    %68 = tpu.concatenate %64, %67 in 0 : vector<1x128xf32>, vector<1x128xf32> -> vector<2x128xf32>
    %c0_82 = arith.constant 0 : index
    %c0_83 = arith.constant 0 : index
    %c0_84 = arith.constant 0 : index
    %c0_85 = arith.constant 0 : index
    %69 = vector.load %arg6[%c0_82, %c0_83, %c0_84, %c0_85] : memref<1x1x2x128xf32, #tpu.memory_space<vmem>>, vector<1x1x2x128xf32>
    %70 = vector.shape_cast %69 : vector<1x1x2x128xf32> to vector<2x128xf32>
    %71 = vector.shape_cast %68 : vector<2x128xf32> to vector<1x1x2x128xf32>
    tpu.vector_store %arg6[%c0_82, %c0_83, %c0_84, %c0_85], %71 {strides = array<i32>} : memref<1x1x2x128xf32, #tpu.memory_space<vmem>>, vector<1x1x2x128xf32>,
    return
  }
  func.func @transform_0(%arg0: i32, %arg1: i32) -> (i32, i32, i32, i32) {
    %c0_i32 = arith.constant 0 : i32
    %c0_i32_0 = arith.constant 0 : i32
    %c0_i32_1 = arith.constant 0 : i32
    return %arg0, %arg1, %c0_i32, %c0_i32_0 : i32, i32, i32, i32
  }
  func.func @transform_1(%arg0: i32, %arg1: i32) -> (i32, i32, i32, i32, i32) {
    %c0_i32 = arith.constant 0 : i32
    %c0_i32_0 = arith.constant 0 : i32
    %c0_i32_1 = arith.constant 0 : i32
    %c0_i32_2 = arith.constant 0 : i32
    return %arg0, %arg1, %c0_i32, %c0_i32_0, %c0_i32_1 : i32, i32, i32, i32, i32
  }
  func.func @transform_2(%arg0: i32, %arg1: i32) -> (i32, i32, i32) {
    %c0_i32 = arith.constant 0 : i32
    %c0_i32_0 = arith.constant 0 : i32
    %c0_i32_1 = arith.constant 0 : i32
    %c0_i32_2 = arith.constant 0 : i32
    return %c0_i32, %c0_i32_0, %c0_i32_1 : i32, i32, i32
  }
  func.func @transform_3(%arg0: i32, %arg1: i32) -> (i32, i32, i32, i32) {
    %c0_i32 = arith.constant 0 : i32
    %c0_i32_0 = arith.constant 0 : i32
    %c0_i32_1 = arith.constant 0 : i32
    return %arg0, %arg1, %c0_i32, %c0_i32_0 : i32, i32, i32, i32
  }
  func.func @transform_4(%arg0: i32, %arg1: i32) -> (i32, i32, i32, i32) {
    %c0_i32 = arith.constant 0 : i32
    %c0_i32_0 = arith.constant 0 : i32
    %c0_i32_1 = arith.constant 0 : i32
    return %arg0, %arg1, %c0_i32, %c0_i32_0 : i32, i32, i32, i32
  }
}

</mosaic_0001>

<bundles_post_ra>
// kernel: conv3x3_gn_relu.3
= control target key start
LH: loop header
LB: loop body
LE: loop exit
PB: predicated region body
PF: predicated region fallthrough
CT: control target
= control target key end

     0   :  { %s1154_s0 = inlined_call_operand.hbm [shape: f32[2,16,16,128], index: 0, kind: input, shape index: {}]   ;;  %s1155_s1 = inlined_call_operand.hbm [shape: f32[1,128], index: 1, kind: input, shape index: {}]   ;;  %s1156_s2 = inlined_call_operand.hbm [shape: f32[1,128], index: 2, kind: input, shape index: {}]   ;;  %s1157_s3 = inlined_call_operand.hbm [shape: f32[2,16,16,128], index: 3, kind: output, shape index: {}]  }
   0x1   :  { %1166 = sst [smem:[#allocation14_spill]] %s1155_s1 }
   0x2   :  { %1167 = sst [smem:[#allocation15_spill]] %s1156_s2 }
   0x3   :  { %8 = vsyncpa [#allocation3], 0 }
   0x4   :  { %10 = vsyncpa [#allocation3 + $0x1], 0 }
   0x5   :  { %11 = vsyncpa [#allocation6], 0 }
   0x6   :  { %12 = vsyncpa [#allocation4], 0 }
   0x7   :  { %14 = vsyncpa [#allocation4 + $0x1], 0  ;;  %s803_s12 = smov 0   ;;  %s805_s13 = smov 0  }
   0x8   :  { %s807_s14 = smov 0   ;;  %s809_s15 = smov 0  }
   0x9   :  { %s811_s16 = smov 0   ;;  %s813_s17 = smov 0  }
   0xa   :  { %s815_s18 = smov 0   ;;  %s817_s19 = smov 0  }
   0xb LB: > { %1168 = sst [smem:[#allocation12_spill]] %s765_s17  ;;  %s455_s20 = sadd.s32 4294967295, %s773_s19   ;;  %s773_s19 = sphi %s817_s19, %s20_s19   ;;  %s769_s18 = sphi %s815_s18, %s1193_s18   ;;  %s765_s17 = sphi %s813_s17, %s1188_s17   ;;  %s761_s16 = sphi %s811_s16, %s1192_s16   ;;  %s757_s15 = sphi %s809_s15, %s1187_s15   ;;  %s753_s14 = sphi %s807_s14, %s1191_s14   ;;  %s749_s13 = sphi %s805_s13, %s1190_s13   ;;  %s745_s12 = sphi %s803_s12, %s1189_s12  }
   0xc   : > { %s456_s21 = sadd.s32 4294967294, %s773_s19   ;;  %p48_p0 = scmp.ne.s32.totalorder %s753_s14, %s749_s13 }
   0xd   : > { %p49_p1 = scmp.eq.s32.totalorder %s773_s19, 0  ;;  %p54_p2 = scmp.ne.s32.totalorder %s749_s13, %s745_s12 }
   0xe   : > { %p851_p3 = scmp.eq.s32.totalorder %s455_s20, 0  ;;  %p122_p4 = scmp.eq.s32.totalorder %s455_s20, 3 }
   0xf   : > { %p855_p5 = por %p49_p1, %p48_p0  ;;  %p128_p6 = scmp.eq.s32.totalorder %s456_s21, 3 }
  0x10   : > { %s1169_s23 = scalar_select %p851_p3, 1, 0 }
  0x11   : > { %p861_p7 = por %p851_p3, %p54_p2  ;;  %p865_p8 = por %p122_p4, %p48_p0 }
  0x12   : > { %p869_p9 = por %p128_p6, %p54_p2  ;;  %p457_p10 = scmp.ge.s32.totalorder %s773_s19, 1 }
  0x13   : > { %s1171_s25 = scalar_select %p861_p7, 1, 0 }
  0x14   : > { %s1172_s26 = scalar_select %p865_p8, 1, 0 }
  0x15   : > { %s1173_s27 = scalar_select %p869_p9, 1, 0 }
  0x16   : > { %p135_p11 = scmp.lt.s32.totalorder %s773_s19, 5  ;;  %s775_s29 = smov [#allocation5]  }
  0x17   : > { %s148_s30 = sshll.u32 %s775_s29, 4  ;;  %p511_p13 = scmp.lt.s32.totalorder %s773_s19, 4  ;;  %s149_s30 = int_to_ptr.vmem [resolvable:$true] %s148_s30 }
  0x18   : > { %p875_p12 = pnand %p457_p10, %p135_p11  ;;  %s776_s5 = smov [#allocation7]  }
  0x19   : > { %p884_p1 = pnand %p511_p13, %p855_p5  ;;  %s159_s6 = sshll.u32 %s776_s5, 4  ;;  %s894_s6 = int_to_ptr.vmem [resolvable:$true] %s159_s6 }
  0x1a   : > { %s1174_s28 = scalar_select %p875_p12, 1, 0 }
  0x1b   : > { %p494_p0 = pneg %p875_p12  ;;  %s1177_s1 = sld [smem:[#allocation14_spill]] }
  0x1c   : > { %s1175_s4 = scalar_select %p884_p1, 1, 0 }
  0x1d   : > { %p890_p2 = pnand %p494_p0, %p851_p3 }
  0x1f   : > { %p587_p5 = pneg %p890_p2 }
  0x21   : > { %s585_s10 = scalar_lea.hbm %s1177_s1, 16 }
  0x22   : > { %p586_p4 = scmp.ne.s32.totalorder %s1177_s1, %s585_s10  ;;  %p592_p11 = scmp.lt.u32.totalorder %s585_s10, %s1177_s1 }
  0x24   : > { %p588_p6 = pnand %p587_p5, %p586_p4 }
  0x26   : > { %p589_p10 = pneg %p588_p6 }
  0x28   : > { %p594_p13 = pnand %p592_p11, %p589_p10 }
  0x2a   : > { %597 = shalt.err (!%p594_p13)
}
  0x2b   : > { %s598_s29 = scalar_lea.vmem %s149_s30, 16  ;;  %s605_s5 = scalar_lea.vmem %s149_s30, 32 }
  0x2c   : > { %p599_p0 = scmp.ne.s32.totalorder %s149_s30, %s598_s29  ;;  %p606_p3 = scmp.lt.s32.totalorder %s149_s30, %s149_s30 }
  0x2d   : > { %p607_p7 = scmp.lt.s32.totalorder %s605_s5, %s598_s29 }
  0x2e   : > { %p601_p9 = pnand %p599_p0, %p587_p5 }
  0x2f   : > { %p608_p12 = por %p607_p7, %p606_p3 }
  0x30   : > { %p602_p8 = pneg %p601_p9 }
  0x32   : > { %p609_p1 = pnand %p608_p12, %p602_p8 }
  0x34   : > { %612 = shalt.err (!%p609_p1)
}
  0x35   : > { %497 = dma.hbm_to_vmem [thread:$0]  (!%p890_p2), %s1177_s1, 16, %s149_s30, [#allocation6]  }
  0x36   : > { %s1178_s2 = sld [smem:[#allocation15_spill]] }
  0x3c   : > { %s613_s20 = scalar_lea.hbm %s1178_s2, 16 }
  0x3d   : > { %p614_p9 = scmp.ne.s32.totalorder %s1178_s2, %s613_s20  ;;  %p620_p8 = scmp.lt.u32.totalorder %s613_s20, %s1178_s2 }
  0x3f   : > { %p616_p3 = pnand %p614_p9, %p587_p5 }
  0x41   : > { %p617_p7 = pneg %p616_p3 }
  0x43   : > { %p622_p12 = pnand %p620_p8, %p617_p7 }
  0x45   : > { %625 = shalt.err (!%p622_p12)
}
  0x46   : > { %s626_s30 = scalar_lea.vmem %s894_s6, 16  ;;  %s633_s8 = scalar_lea.vmem %s894_s6, 32 }
  0x47   : > { %p627_p1 = scmp.ne.s32.totalorder %s894_s6, %s626_s30  ;;  %p634_p10 = scmp.lt.s32.totalorder %s894_s6, %s894_s6 }
  0x48   : > { %p635_p11 = scmp.lt.s32.totalorder %s633_s8, %s626_s30 }
  0x49   : > { %p629_p4 = pnand %p627_p1, %p587_p5 }
  0x4a   : > { %p636_p13 = por %p635_p11, %p634_p10 }
  0x4b   : > { %p630_p6 = pneg %p629_p4 }
  0x4d   : > { %p637_p0 = pnand %p636_p13, %p630_p6 }
  0x4f   : > { %640 = shalt.err (!%p637_p0)
}
  0x50   : > { %500 = dma.hbm_to_vmem [thread:$0]  (!%p890_p2), %s1178_s2, 16, %s894_s6, [#allocation6]  }
  0x51   : > { %s29_s11 = sadd.s32 1, %s765_s17  ;;  %s32_s20 = sadd.s32 1, %s769_s18 }
  0x52   : > { %p30_p5 = scmp.ge.s32.totalorder %s29_s11, 2  ;;  %s170_s21 = sand.u32 1, %s753_s14  }
  0x53   : > { %s461_s24 = sshll.u32 %s170_s21, 7  ;;  %s480_s29 = sshll.u32 %s765_s17, 4 }
  0x54   : > { %s1195_s11 = smov (%p30_p5, %s29_s11), 0  ;;  %s1197_s20 = smov (!%p30_p5, %s32_s20), %s769_s18 }
  0x55   : > { %1179 = sst [smem:[#allocation13_spill]] %s1195_s11  ;;  %s37_s7 = ssub.s32 %s765_s17, %s1195_s11 }
  0x56   : > { %p34_p9 = scmp.ge.s32.totalorder %s1197_s20, 2  ;;  %s464_s5 = sshll.u32 %s769_s18, 5 }
  0x57   : > { %s174_s30 = scalar_lea.vmem [#allocation2], %s461_s24  ;;  %s181_s8 = sadd.s32 %s480_s29, %s464_s5 }
  0x58   : > { %s184_s6 = sshll.u32 %s174_s30, 4  ;;  %s1199_s20 = smov (%p34_p9, %s1197_s20), 0  ;;  %s956_s6 = int_to_ptr.vmem [resolvable:$true] %s184_s6 }
  0x59   : > { %s36_s9 = ssub.s32 %s769_s18, %s1199_s20  ;;  %s465_s10 = sshll.u32 %s181_s8, 7 }
  0x5a   : > { %s38_s22 = sor.u32 %s37_s7, %s36_s9  ;;  %s963_s11 = scalar_lea.hbm %s1154_s0, %s465_s10 }
  0x5b   : > { %p39_p2 = scmp.eq.s32.totalorder %s38_s22, 0  ;;  %s1180_s24 = sadd.s32 1, %s753_s14 }
  0x5c   : > { %s970_s17 = scalar_lea.sflag [#allocation3], %s170_s21  ;;  %s641_s29 = scalar_lea.hbm %s963_s11, 2048 }
  0x5d   : > { %s968_s30 = scalar_select %p39_p2, %s753_s14, %s1180_s24  }
  0x5e   : > { %p642_p3 = scmp.ne.s32.totalorder %s963_s11, %s641_s29  ;;  %p1181_p7 = scmp.ne.s32.totalorder %s1175_s4, 0 }
  0x5f   : > { %s646_s7 = scalar_lea.hbm %s1154_s0, 8192  ;;  %p647_p4 = scmp.lt.u32.totalorder %s963_s11, %s1154_s0 }
  0x60   : > { %p643_p8 = pneg %p1181_p7  ;;  %p648_p6 = scmp.lt.u32.totalorder %s646_s7, %s641_s29 }
  0x61   : > { %p650_p11 = scmp.lt.u32.totalorder %s641_s29, %s963_s11 }
  0x62   : > { %p644_p12 = pnand %p643_p8, %p642_p3  ;;  %p649_p10 = por %p648_p6, %p647_p4 }
  0x64   : > { %p645_p1 = pneg %p644_p12  ;;  %p651_p13 = por %p650_p11, %p649_p10 }
  0x66   : > { %p652_p0 = pnand %p651_p13, %p645_p1 }
  0x68   : > { %655 = shalt.err (!%p652_p0)
}
  0x69   : > { %s656_s22 = scalar_lea.vmem %s956_s6, 2048  ;;  %s777_s21 = smov [#allocation2]  }
  0x6a   : > { %p657_p5 = scmp.ne.s32.totalorder %s956_s6, %s656_s22  ;;  %s661_s9 = sshll.u32 %s777_s21, 4  ;;  %s662_s9 = int_to_ptr.vmem [resolvable:$false] %s661_s9 }
  0x6b   : > { %s663_s10 = scalar_lea.vmem %s662_s9, 4096  ;;  %p664_p3 = scmp.lt.s32.totalorder %s956_s6, %s662_s9 }
  0x6c   : > { %p659_p9 = pnand %p657_p5, %p643_p8  ;;  %p665_p12 = scmp.lt.s32.totalorder %s663_s10, %s656_s22 }
  0x6e   : > { %p660_p2 = pneg %p659_p9  ;;  %p666_p4 = por %p665_p12, %p664_p3 }
  0x70   : > { %p667_p6 = pnand %p666_p4, %p660_p2 }
  0x72   : > { %670 = shalt.err (!%p667_p6)
}
  0x73   : > { %s778_s24 = smov 128   ;;  %s779_s29 = smov 8  }
  0x74   : > { %504 = dma.hbm_to_vmem [thread:$0]  (!%p1181_p7), %s963_s11, 2048, %s956_s6, %s970_s17, %s778_s24, %s778_s24, %s779_s29  }
  0x75   : > { %p1182_p8 = scmp.ne.s32.totalorder %s1174_s28, 0 }
  0x76   : > { %s1001_s1 = sand.u32 (!%p1182_p8), 1, %s749_s13   ;;  %p1183_p1 = scmp.ne.s32.totalorder (!%p1182_p8), %s1171_s25, 0 }
  0x77   : > { %196 = sbr.rel (%p1182_p8) target bundleno = 163 (0xa3), region = 32  ;;  %s467_s2 = sshll.u32 (!%p1182_p8), %s1001_s1, 7 }
  0x78   : > { %s199_s7 = scalar_lea.sflag (!%p1182_p8), [#allocation3], %s1001_s1  ;;  %s1007_s5 = scalar_lea.vmem (!%p1182_p8), [#allocation2], %s467_s2 }
  0x7e   : > { %732 = dma.done.wait (%p1183_p1), %s199_s7, 2048  }
  0x7f   : > { %734 = vsyncadd (%p1183_p1), %s199_s7, 4294965248  ;;  %p1184_p7 = scmp.ne.s32.totalorder %s1169_s23, 0 }
  0x81   : > { %736 = dma.done.wait (%p1184_p7), [#allocation6], 32  }
  0x82   : > { %738 = vsyncadd (%p1184_p7), [#allocation6], 4294967264  ;;  %v235_v0 = vld [vmem:[%s1007_s5] sm:$0xff]  ;;  %v236_v4 = vld [vmem:[%s1007_s5 + $0x8] sm:$0xff]  ;;  %s481_s17 = sshll.u32 %s757_s15, 4  ;;  %s476_s23 = sshll.u32 %s761_s16, 5 }
  0x83   : > { %v1018_v1 = vld [vmem:[#allocation5] ss:$0 sm:$0xff]  ;;  %v1020_v2 = vld [vmem:[#allocation7] ss:$0 sm:$0xff]  ;;  %v237_v5 = vld [vmem:[%s1007_s5 + $0x10] sm:$0xff]  ;;  %s1056_s15 = scalar_lea.vmem [#allocation8], %s467_s2  ;;  %s1061_s16 = sadd.s32 %s481_s17, %s476_s23 }
  0x84   : > { %v258_v3 = vmul.f32 %v1018_v1, %v235_v0  ;;  %v238_v6 = vld [vmem:[%s1007_s5 + $0x18] sm:$0xff]  ;;  %v259_v7 = vmul.f32 %v1018_v1, %v236_v4  ;;  %v260_v8 = vmul.f32 %v1018_v1, %v237_v5  ;;  %v239_v10 = vld [vmem:[%s1007_s5 + $0x20] sm:$0xff]  ;;  %v240_v11 = vld [vmem:[%s1007_s5 + $0x28] sm:$0xff]  ;;  %s477_s25 = sshll.u32 %s1061_s16, 7  ;;  %s346_s28 = sshll.u32 %s1056_s15, 4  ;;  %s1093_s28 = int_to_ptr.vmem [resolvable:$true] %s346_s28 }
  0x85   : > { %v261_v9 = vmul.f32 %v1018_v1, %v238_v6  ;;  %v241_v12 = vld [vmem:[%s1007_s5 + $0x30] sm:$0xff]  ;;  %v262_v14 = vmul.f32 %v1018_v1, %v239_v10  ;;  %v263_v15 = vmul.f32 %v1018_v1, %v240_v11  ;;  %v242_v17 = vld [vmem:[%s1007_s5 + $0x38] sm:$0xff]  ;;  %v243_v22 = vld [vmem:[%s1007_s5 + $0x40] sm:$0xff]  ;;  %s1091_s6 = scalar_lea.hbm %s1157_s3, %s477_s25  ;;  %s330_s8 = scalar_lea.sflag [#allocation4], %s1001_s1 }
  0x86   : > { %v281_v13 = vadd.f32 %v1020_v2, %v258_v3  ;;  %v264_v16 = vmul.f32 %v1018_v1, %v241_v12  ;;  %v282_v18 = vadd.f32 %v1020_v2, %v259_v7  ;;  %v283_v19 = vadd.f32 %v1020_v2, %v260_v8  ;;  %v244_v27 = vld [vmem:[%s1007_s5 + $0x48] sm:$0xff]  ;;  %v245_v28 = vld [vmem:[%s1007_s5 + $0x50] sm:$0xff]  ;;  %v246_v29 = vld [vmem:[%s1007_s5 + $0x58] sm:$0xff]  ;;  %s671_s22 = scalar_lea.vmem %s1093_s28, 2048  ;;  %p1185_p11 = scmp.ne.s32.totalorder %s1172_s26, 0 }
  0x87   : > { %v284_v20 = vadd.f32 %v1020_v2, %v261_v9  ;;  %v265_v21 = vmul.f32 %v1018_v1, %v242_v17  ;;  %v285_v24 = vadd.f32 %v1020_v2, %v262_v14  ;;  %v286_v25 = vadd.f32 %v1020_v2, %v263_v15  ;;  %v247_v34 = vld [vmem:[%s1007_s5 + $0x60] sm:$0xff]  ;;  %v248_v35 = vld [vmem:[%s1007_s5 + $0x68] sm:$0xff]  ;;  %v249_v36 = vld [vmem:[%s1007_s5 + $0x70] sm:$0xff]  ;;  %p672_p10 = scmp.ne.s32.totalorder %s1093_s28, %s671_s22  ;;  %s780_s21 = smov [#allocation8]  }
  0x88   : > { %v297_v23 = vmax.f32 %v281_v13, 0.0  ;;  %v287_v26 = vadd.f32 %v1020_v2, %v264_v16  ;;  %v298_v30 = vmax.f32 %v282_v18, 0.0  ;;  %v299_v31 = vmax.f32 %v283_v19, 0.0  ;;  %v250_v41 = vld [vmem:[%s1007_s5 + $0x78] sm:$0xff]  ;;  %s675_s9 = sshll.u32 %s780_s21, 4  ;;  %s676_s9 = int_to_ptr.vmem [resolvable:$false] %s675_s9 }
  0x89   : > { %v300_v32 = vmax.f32 %v284_v20, 0.0  ;;  %v288_v33 = vadd.f32 %v1020_v2, %v265_v21  ;;  %v301_v37 = vmax.f32 %v285_v24, 0.0  ;;  %v302_v38 = vmax.f32 %v286_v25, 0.0  ;;  %p673_p13 = pnand %p672_p10, %p1185_p11  ;;  %s677_s10 = scalar_lea.vmem %s676_s9, 4096 }
  0x8a   : > { %313 = vst [vmem:[%s1056_s15] sm:$0xff] %v297_v23  ;;  %v303_v39 = vmax.f32 %v287_v26, 0.0  ;;  %v266_v40 = vmul.f32 %v1018_v1, %v243_v22  ;;  %314 = vst [vmem:[%s1056_s15 + $0x8] sm:$0xff] %v298_v30  ;;  %v267_v43 = vmul.f32 %v1018_v1, %v244_v27  ;;  %v268_v44 = vmul.f32 %v1018_v1, %v245_v28  ;;  %p678_p5 = scmp.lt.s32.totalorder %s1093_s28, %s676_s9  ;;  %p679_p9 = scmp.lt.s32.totalorder %s677_s10, %s671_s22 }
  0x8b   : > { %315 = vst [vmem:[%s1056_s15 + $0x10] sm:$0xff] %v299_v31  ;;  %316 = vst [vmem:[%s1056_s15 + $0x18] sm:$0xff] %v300_v32  ;;  %v304_v42 = vmax.f32 %v288_v33, 0.0  ;;  %v269_v45 = vmul.f32 %v1018_v1, %v246_v29  ;;  %v270_v47 = vmul.f32 %v1018_v1, %v247_v34  ;;  %v271_v48 = vmul.f32 %v1018_v1, %v248_v35  ;;  %p674_p0 = pneg %p673_p13 }
  0x8c   : > { %317 = vst [vmem:[%s1056_s15 + $0x20] sm:$0xff] %v301_v37  ;;  %318 = vst [vmem:[%s1056_s15 + $0x28] sm:$0xff] %v302_v38  ;;  %v289_v46 = vadd.f32 %v1020_v2, %v266_v40  ;;  %v272_v49 = vmul.f32 %v1018_v1, %v249_v36  ;;  %v290_v50 = vadd.f32 %v1020_v2, %v267_v43  ;;  %p680_p2 = por %p679_p9, %p678_p5 }
  0x8d   : > { %319 = vst [vmem:[%s1056_s15 + $0x30] sm:$0xff] %v303_v39  ;;  %320 = vst [vmem:[%s1056_s15 + $0x38] sm:$0xff] %v304_v42  ;;  %v291_v51 = vadd.f32 %v1020_v2, %v268_v44  ;;  %v292_v52 = vadd.f32 %v1020_v2, %v269_v45  ;;  %v273_v53 = vmul.f32 %v1018_v1, %v250_v41 }
  0x8e   : > { %v305_v54 = vmax.f32 %v289_v46, 0.0  ;;  %v293_v55 = vadd.f32 %v1020_v2, %v270_v47  ;;  %v294_v56 = vadd.f32 %v1020_v2, %v271_v48  ;;  %v295_v57 = vadd.f32 %v1020_v2, %v272_v49  ;;  %p681_p3 = pnand %p680_p2, %p674_p0 }
  0x8f   : > { %v306_v58 = vmax.f32 %v290_v50, 0.0  ;;  %v307_v59 = vmax.f32 %v291_v51, 0.0  ;;  %v308_v60 = vmax.f32 %v292_v52, 0.0  ;;  %v296_v61 = vadd.f32 %v1020_v2, %v273_v53 }
  0x90   : > { %321 = vst [vmem:[%s1056_s15 + $0x40] sm:$0xff] %v305_v54  ;;  %v309_v62 = vmax.f32 %v293_v55, 0.0  ;;  %v310_v63 = vmax.f32 %v294_v56, 0.0  ;;  %v311_v0 = vmax.f32 %v295_v57, 0.0 }
  0x91   : > { %322 = vst [vmem:[%s1056_s15 + $0x48] sm:$0xff] %v306_v58  ;;  %323 = vst [vmem:[%s1056_s15 + $0x50] sm:$0xff] %v307_v59  ;;  %v312_v1 = vmax.f32 %v296_v61, 0.0 }
  0x92   : > { %324 = vst [vmem:[%s1056_s15 + $0x58] sm:$0xff] %v308_v60  ;;  %325 = vst [vmem:[%s1056_s15 + $0x60] sm:$0xff] %v309_v62 }
  0x93   : > { %326 = vst [vmem:[%s1056_s15 + $0x68] sm:$0xff] %v310_v63  ;;  %327 = vst [vmem:[%s1056_s15 + $0x70] sm:$0xff] %v311_v0 }
  0x94   : > { %328 = vst [vmem:[%s1056_s15 + $0x78] sm:$0xff] %v312_v1 }
  0x95   : > { %684 = shalt.err (!%p681_p3)
}
  0x96   : > { %s685_s24 = scalar_lea.hbm %s1091_s6, 2048  ;;  %s689_s7 = scalar_lea.hbm %s1157_s3, 8192 }
  0x97   : > { %p686_p12 = scmp.ne.s32.totalorder %s1091_s6, %s685_s24  ;;  %p690_p8 = scmp.lt.u32.totalorder %s1091_s6, %s1157_s3 }
  0x98   : > { %p691_p1 = scmp.lt.u32.totalorder %s689_s7, %s685_s24  ;;  %p693_p10 = scmp.lt.u32.totalorder %s685_s24, %s1091_s6 }
  0x99   : > { %p687_p4 = pnand %p686_p12, %p1185_p11 }
  0x9a   : > { %p692_p7 = por %p691_p1, %p690_p8 }
  0x9b   : > { %p688_p6 = pneg %p687_p4 }
  0x9c   : > { %p694_p13 = por %p693_p10, %p692_p7 }
  0x9e   : > { %p695_p0 = pnand %p694_p13, %p688_p6 }
  0xa0   : > { %698 = shalt.err (!%p695_p0)
}
  0xa1   : > { %s781_s23 = smov 128   ;;  %s782_s15 = smov 8  }
  0xa2   : > { %492 = dma.vmem_to_hbm [thread:$0]  (%p1185_p11), %s1093_s28, 2048, %s1091_s6, %s330_s8, %s781_s23, %s781_s23, %s782_s15  }
  0xa3 PF: > { %p514_p5 = scmp.ge.s32.totalorder %s773_s19, 2  ;;  %s361_s16 = sand.u32 1, %s745_s12  }
  0xa4   : > { %p1186_p9 = scmp.ne.s32.totalorder %s1173_s27, 0  ;;  %s362_s25 = scalar_lea.sflag [#allocation4], %s361_s16 }
  0xa6   : > { %p506_p2 = pnand %p514_p5, %p1186_p9 }
  0xa8   : > { %740 = dma.done.wait (!%p506_p2), %s362_s25, 2048  }
  0xa9   : > { %742 = vsyncadd (!%p506_p2), %s362_s25, 4294965248  ;;  %s20_s19 = sadd.s32 1, %s773_s19   ;;  %s1187_s15 = sld [smem:[#allocation12_spill]] }
  0xaa   : > { %p17_p3 = scmp.ge.s32.totalorder %s20_s19, 6   ;;  %s1188_s17 = sld [smem:[#allocation13_spill]] }
  0xab   : > { %s1189_s12 = smov %s749_s13  ;;  %s1190_s13 = smov %s753_s14 }
  0xac   : > { %s1191_s14 = smov %s968_s30  ;;  %s1192_s16 = smov %s769_s18 }
  0xad   : > { %s1193_s18 = smov %s1199_s20  ;;  %19 = sbr.rel (!%p17_p3) target bundleno = 11 (0xb), region = 85 }
  0xb4   :  { %367 = vsyncpa [#allocation3], 1 }
  0xb5   :  { %369 = vsyncpa [#allocation3 + $0x1], 1 }
  0xb6   :  { %370 = vsyncpa [#allocation6], 1 }
  0xb7   :  { %371 = vsyncpa [#allocation4], 1 }
  0xb8   :  { %373 = vsyncpa [#allocation4 + $0x1], 1 }

// kernel: conv3x3_gn_relu.2
= control target key start
LH: loop header
LB: loop body
LE: loop exit
PB: predicated region body
PF: predicated region fallthrough
CT: control target
= control target key end

     0   :  { %s4673_s0 = inlined_call_operand.hbm [shape: f32[2,16,18,128], index: 0, kind: input, shape index: {}]   ;;  %s4674_s1 = inlined_call_operand.hbm [shape: f32[2,2,2,18,128], index: 1, kind: input, shape index: {}]   ;;  %s4675_s2 = inlined_call_operand.hbm [shape: f32[9,128,128], index: 2, kind: input, shape index: {}]   ;;  %s4676_s3 = inlined_call_operand.hbm [shape: f32[2,16,16,128], index: 3, kind: output, shape index: {0}]   ;;  %s4677_s4 = inlined_call_operand.hbm [shape: f32[2,2,2,128], index: 4, kind: output, shape index: {1}]  }
   0x1   :  { %4690 = sst [smem:[#allocation23_spill]] %s4673_s0 }
   0x2   :  { %4691 = sst [smem:[#allocation24_spill]] %s4675_s2 }
   0x3   :  { %10 = vsyncpa [#allocation4], 0 }
   0x4   :  { %12 = vsyncpa [#allocation4 + $0x1], 0 }
   0x5   :  { %13 = vsyncpa [#allocation7], 0 }
   0x6   :  { %15 = vsyncpa [#allocation7 + $0x1], 0 }
   0x7   :  { %16 = vsyncpa [#allocation5], 0 }
   0x8   :  { %18 = vsyncpa [#allocation5 + $0x1], 0 }
   0x9   :  { %19 = vsyncpa [#allocation11], 0 }
   0xa   :  { %21 = vsyncpa [#allocation11 + $0x1], 0  ;;  %s3982_s15 = smov 0   ;;  %s3984_s16 = smov 0  }
   0xb   :  { %s3986_s17 = smov 0   ;;  %s3988_s18 = smov 0  }
   0xc   :  { %s3990_s19 = smov 0   ;;  %s3992_s20 = smov 0  }
   0xd   :  { %s3994_s21 = smov 0   ;;  %s3996_s22 = smov 0  }
   0xe LB: > { %4692 = sst [smem:[#allocation17_spill]] %s3918_s15  ;;  %s4023_s23 = sadd.s32 4294967295, %s3946_s22   ;;  %s3946_s22 = sphi %s3996_s22, %s27_s22   ;;  %s3942_s21 = sphi %s3994_s21, %s4725_s21   ;;  %s3938_s20 = sphi %s3992_s20, %s4724_s20   ;;  %s3934_s19 = sphi %s3990_s19, %s4723_s19   ;;  %s3930_s18 = sphi %s3988_s18, %s4722_s18   ;;  %s3926_s17 = sphi %s3986_s17, %s4717_s17   ;;  %s3922_s16 = sphi %s3984_s16, %s4721_s16   ;;  %s3918_s15 = sphi %s3982_s15, %s4720_s15  }
   0xf   : > { %4693 = sst [smem:[#allocation18_spill]] %s3926_s17  ;;  %s2359_s24 = sadd.s32 4294967294, %s3946_s22  }
  0x10   : > { %p61_p0 = scmp.ne.s32.totalorder %s3922_s16, %s3918_s15  ;;  %p4678_p1 = scmp.eq.s32.totalorder %s4023_s23, 0 }
  0x11   : > { %p142_p3 = scmp.eq.s32.totalorder %s2359_s24, 3  ;;  %p2360_p5 = scmp.ge.s32.totalorder %s3946_s22, 1 }
  0x12   : > { %p4032_p4 = por %p4678_p1, %p61_p0  ;;  %p177_p7 = scmp.lt.s32.totalorder %s3946_s22, 5 }
  0x13   : > { %p4037_p6 = por %p142_p3, %p61_p0  ;;  %s3948_s28 = smov [#allocation8]  }
  0x14   : > { %s4694_s25 = scalar_select %p4032_p4, 1, 0 }
  0x15   : > { %s4695_s26 = scalar_select %p4037_p6, 1, 0 }
  0x16   : > { %p4042_p8 = pnand %p2360_p5, %p177_p7  ;;  %s189_s29 = sshll.u32 %s3948_s28, 4  ;;  %s190_s29 = int_to_ptr.vmem [resolvable:$true] %s189_s29 }
  0x17   : > { %4696 = sst [smem:[#allocation19_spill]] %s4695_s26  ;;  %s4699_s2 = sld [smem:[#allocation24_spill]] }
  0x18   : > { %s4697_s27 = scalar_select %p4042_p8, 1, 0 }
  0x19   : > { %p3629_p9 = pneg %p4042_p8 }
  0x1b   : > { %p4050_p10 = pnand %p3629_p9, %p4678_p1 }
  0x1d   : > { %s3720_s7 = scalar_lea.hbm %s4699_s2, 18432  ;;  %p3722_p12 = pneg %p4050_p10 }
  0x1e   : > { %p3721_p11 = scmp.ne.s32.totalorder %s4699_s2, %s3720_s7  ;;  %p3727_p3 = scmp.lt.u32.totalorder %s3720_s7, %s4699_s2 }
  0x20   : > { %p3723_p13 = pnand %p3722_p12, %p3721_p11 }
  0x22   : > { %p3724_p0 = pneg %p3723_p13 }
  0x24   : > { %p3729_p5 = pnand %p3727_p3, %p3724_p0 }
  0x26   : > { %3732 = shalt.err (!%p3729_p5)
}
  0x27   : > { %s3733_s12 = scalar_lea.vmem %s190_s29, 18432  ;;  %p3741_p2 = scmp.lt.s32.totalorder %s190_s29, %s190_s29 }
  0x28   : > { %p3734_p7 = scmp.ne.s32.totalorder %s190_s29, %s3733_s12  ;;  %p3742_p6 = scmp.lt.s32.totalorder %s3733_s12, %s3733_s12 }
  0x2a   : > { %p3736_p9 = pnand %p3734_p7, %p3722_p12  ;;  %p3743_p4 = por %p3742_p6, %p3741_p2 }
  0x2c   : > { %p3737_p1 = pneg %p3736_p9 }
  0x2e   : > { %p3744_p8 = pnand %p3743_p4, %p3737_p1 }
  0x30   : > { %3747 = shalt.err (!%p3744_p8)
}
  0x31   : > { %s4681_s13 = smov 128   ;;  %s4683_s14 = smov 8  }
  0x32   : > { %3632 = dma.hbm_to_vmem [thread:$0]  (!%p4050_p10), %s4699_s2, 18432, %s190_s29, [#allocation7], %s4681_s13, %s4681_s13, %s4683_s14  }
  0x33   : > { %s36_s5 = sadd.s32 1, %s3938_s20  ;;  %s39_s6 = sadd.s32 1, %s3942_s21 }
  0x34   : > { %p37_p1 = scmp.ge.s32.totalorder %s36_s5, 2  ;;  %s48_s7 = sadd.s32 1, %s3926_s17 }
  0x35   : > { %p55_p2 = scmp.ne.s32.totalorder %s3926_s17, %s3922_s16  ;;  %p56_p4 = scmp.eq.s32.totalorder %s3946_s22, 0 }
  0x36   : > { %s4727_s5 = smov (%p37_p1, %s36_s5), 0  ;;  %s4729_s6 = smov (!%p37_p1, %s39_s6), %s3942_s21 }
  0x37   : > { %4700 = sst [smem:[#allocation20_spill]] %s4727_s5  ;;  %s44_s30 = ssub.s32 %s3938_s20, %s4727_s5 }
  0x38   : > { %p41_p6 = scmp.ge.s32.totalorder %s4729_s6, 2  ;;  %p4701_p8 = scmp.eq.s32.totalorder %s4023_s23, 3 }
  0x39   : > { %p57_p10 = por %p56_p4, %p55_p2  ;;  %p3648_p12 = scmp.lt.s32.totalorder %s3946_s22, 4 }
  0x3a   : > { %p4086_p11 = por %p4701_p8, %p55_p2  ;;  %s4731_s6 = smov (%p41_p6, %s4729_s6), 0 }
  0x3b   : > { %4703 = sst [smem:[#allocation21_spill]] %s4731_s6  ;;  %s4094_s29 = sand.u32 1, %s3926_s17  }
  0x3c   : > { %s3610_s9 = smul.u32 24, %s3938_s20  ;;  %s43_s10 = ssub.s32 %s3942_s21, %s4731_s6 }
  0x3d   : > { %s45_s11 = sor.u32 %s44_s30, %s43_s10  ;;  %s3609_s12 = smul.u32 192, %s4094_s29 }
  0x3e   : > { %p46_p13 = scmp.eq.s32.totalorder %s45_s11, 0  ;;  %s3611_s24 = smul.u32 48, %s3942_s21 }
  0x3f   : > { %p4101_p0 = pnand %p3648_p12, %p57_p10  ;;  %s207_s2 = scalar_lea.vmem [#allocation3], %s3609_s12 }
  0x40   : > { %s4106_s13 = scalar_select %p46_p13, %s3926_s17, %s48_s7  }
  0x41   : > { %s214_s14 = sadd.s32 %s3611_s24, %s3610_s9  ;;  %s217_s5 = sshll.u32 %s207_s2, 4  ;;  %s4108_s5 = int_to_ptr.vmem [resolvable:$true] %s217_s5 }
  0x42   : > { %4705 = sst [smem:[#allocation22_spill]] %s4106_s13  ;;  %s2365_s26 = sshll.u32 %s214_s14, 7 }
  0x43   : > { %s4706_s0 = sld [smem:[#allocation23_spill]]  ;;  %s204_s10 = scalar_lea.sflag [#allocation4], %s4094_s29 }
  0x44   : > { %p3750_p5 = pneg %p4101_p0 }
  0x49   : > { %s4113_s30 = scalar_lea.hbm %s4706_s0, %s2365_s26  ;;  %s3753_s7 = scalar_lea.hbm %s4706_s0, 12288 }
  0x4a   : > { %s3748_s11 = scalar_lea.hbm %s4113_s30, 3072  ;;  %p3754_p1 = scmp.lt.u32.totalorder %s4113_s30, %s4706_s0 }
  0x4b   : > { %p3749_p3 = scmp.ne.s32.totalorder %s4113_s30, %s3748_s11  ;;  %p3755_p2 = scmp.lt.u32.totalorder %s3753_s7, %s3748_s11 }
  0x4c   : > { %p3757_p6 = scmp.lt.u32.totalorder %s3748_s11, %s4113_s30 }
  0x4d   : > { %p3751_p7 = pnand %p3750_p5, %p3749_p3  ;;  %p3756_p4 = por %p3755_p2, %p3754_p1 }
  0x4f   : > { %p3752_p9 = pneg %p3751_p7  ;;  %p3758_p8 = por %p3757_p6, %p3756_p4 }
  0x51   : > { %p3759_p10 = pnand %p3758_p8, %p3752_p9 }
  0x53   : > { %3762 = shalt.err (!%p3759_p10)
}
  0x54   : > { %s3763_s6 = scalar_lea.vmem %s4108_s5, 3072  ;;  %s3951_s9 = smov [#allocation3]  }
  0x55   : > { %p3764_p12 = scmp.ne.s32.totalorder %s4108_s5, %s3763_s6  ;;  %s3768_s12 = sshll.u32 %s3951_s9, 4  ;;  %s3769_s12 = int_to_ptr.vmem [resolvable:$false] %s3768_s12 }
  0x56   : > { %s3770_s24 = scalar_lea.vmem %s3769_s12, 6144  ;;  %p3771_p7 = scmp.lt.s32.totalorder %s4108_s5, %s3769_s12 }
  0x57   : > { %p3766_p13 = pnand %p3764_p12, %p3750_p5  ;;  %p3772_p1 = scmp.lt.s32.totalorder %s3770_s24, %s3763_s6 }
  0x59   : > { %p3767_p3 = pneg %p3766_p13  ;;  %p3773_p2 = por %p3772_p1, %p3771_p7 }
  0x5b   : > { %p3774_p4 = pnand %p3773_p2, %p3767_p3 }
  0x5d   : > { %3777 = shalt.err (!%p3774_p4)
}
  0x5e   : > { %s4707_s11 = smov 8   ;;  %s4708_s2 = smov 128  }
  0x5f   : > { %3636 = dma.hbm_to_vmem [thread:$0]  (!%p4101_p0), %s4113_s30, 3072, %s4108_s5, %s204_s10, %s4708_s2, %s4708_s2, %s4707_s11  }
  0x60   : > { %s227_s14 = sand.u32 1, %s3946_s22   ;;  %s3612_s7 = smul.u32 48, %s4094_s29 }
  0x61   : > { %s3613_s15 = smul.u32 6, %s3938_s20  ;;  %s4157_s5 = scalar_lea.sflag [#allocation7], %s227_s14 }
  0x62   : > { %s3614_s26 = smul.u32 12, %s3942_s21  ;;  %s231_s6 = scalar_lea.vmem [#allocation6], %s3612_s7 }
  0x63   : > { %s240_s9 = sshll.u32 %s231_s6, 4  ;;  %s3783_s7 = scalar_lea.hbm %s4674_s1, 3072  ;;  %s4150_s9 = int_to_ptr.vmem [resolvable:$true] %s240_s9 }
  0x64   : > { %s237_s12 = sadd.s32 %s3614_s26, %s3613_s15 }
  0x65   : > { %s2366_s24 = sshll.u32 %s237_s12, 7 }
  0x66   : > { %s4155_s17 = scalar_lea.hbm %s4674_s1, %s2366_s24 }
  0x67   : > { %s3778_s29 = scalar_lea.hbm %s4155_s17, 768  ;;  %p3784_p10 = scmp.lt.u32.totalorder %s4155_s17, %s4674_s1 }
  0x68   : > { %p3779_p9 = scmp.ne.s32.totalorder %s4155_s17, %s3778_s29  ;;  %p3785_p12 = scmp.lt.u32.totalorder %s3783_s7, %s3778_s29 }
  0x69   : > { %p3787_p3 = scmp.lt.u32.totalorder %s3778_s29, %s4155_s17 }
  0x6a   : > { %p3781_p6 = pnand %p3779_p9, %p3750_p5  ;;  %p3786_p13 = por %p3785_p12, %p3784_p10 }
  0x6c   : > { %p3782_p8 = pneg %p3781_p6  ;;  %p3788_p7 = por %p3787_p3, %p3786_p13 }
  0x6e   : > { %p3789_p1 = pnand %p3788_p7, %p3782_p8 }
  0x70   : > { %3792 = shalt.err (!%p3789_p1)
}
  0x71   : > { %s3793_s13 = scalar_lea.vmem %s4150_s9, 768  ;;  %s3952_s14 = smov [#allocation6]  }
  0x72   : > { %p3794_p2 = scmp.ne.s32.totalorder %s4150_s9, %s3793_s13  ;;  %s3798_s26 = sshll.u32 %s3952_s14, 4  ;;  %s3799_s26 = int_to_ptr.vmem [resolvable:$false] %s3798_s26 }
  0x73   : > { %s3800_s6 = scalar_lea.vmem %s3799_s26, 1536  ;;  %p3801_p6 = scmp.lt.s32.totalorder %s4150_s9, %s3799_s26 }
  0x74   : > { %p3796_p4 = pnand %p3794_p2, %p3750_p5  ;;  %p3802_p10 = scmp.lt.s32.totalorder %s3800_s6, %s3793_s13 }
  0x76   : > { %p3797_p9 = pneg %p3796_p4  ;;  %p3803_p12 = por %p3802_p10, %p3801_p6 }
  0x78   : > { %p3804_p13 = pnand %p3803_p12, %p3797_p9 }
  0x7a   : > { %3807 = shalt.err (!%p3804_p13)
}
  0x7b   : > { %3639 = dma.hbm_to_vmem [thread:$0]  (!%p4101_p0), %s4155_s17, 768, %s4150_s9, %s4157_s5, %s4708_s2, %s4708_s2, %s4707_s11  }
  0x7c   : > { %p4709_p5 = scmp.ne.s32.totalorder %s4697_s27, 0 }
  0x7d   : > { %s4189_s12 = sand.u32 (!%p4709_p5), 1, %s3922_s16   ;;  %p4710_p8 = scmp.ne.s32.totalorder (!%p4709_p5), %s4694_s25, 0 }
  0x7e   : > { %252 = sbr.rel (%p4709_p5) target bundleno = 592 (0x250), region = 32  ;;  %s255_s29 = scalar_lea.sflag (!%p4709_p5), [#allocation4], %s4189_s12 }
  0x7f   : > { %s3615_s24 = smul.u32 (!%p4709_p5), 192, %s4189_s12 }
  0x81   : > { %s4193_s30 = scalar_lea.vmem (!%p4709_p5), [#allocation3], %s3615_s24 }
  0x85   : > { %3897 = dma.done.wait (%p4710_p8), %s255_s29, 3072  }
  0x86   : > { %3899 = vsyncadd (%p4710_p8), %s255_s29, 4294964224  ;;  %s263_s17 = sand.u32 1, %s4023_s23   ;;  %s3616_s27 = smul.u32 48, %s4189_s12 }
  0x87   : > { %s264_s28 = scalar_lea.sflag [#allocation7], %s263_s17 }
  0x88   : > { %s4201_s11 = scalar_lea.vmem [#allocation6], %s3616_s27 }
  0x89   : > { %3901 = dma.done.wait (%p4710_p8), %s264_s28, 768  }
  0x8a   : > { %3903 = vsyncadd (%p4710_p8), %s264_s28, 4294966528  ;;  %p4711_p0 = scmp.eq.s32.totalorder %s4023_s23, 0 }
  0x8c   : > { %3905 = dma.done.wait (%p4711_p0), [#allocation7], 18432   ;;  %p4712_p3 = pmov %p4711_p0 }
  0x8d   : > { %v420_v0 = vld [vmem:[#allocation8 + $0x80] sm:$0xff]  ;;  %v421_v1 = vld [vmem:[#allocation8 + $0x88] sm:$0xff]  ;;  %v422_v5 = vld [vmem:[#allocation8 + $0x90] sm:$0xff]  ;;  %s2369_s23 = sshll.u32 %s4189_s12, 7  ;;  %s2384_s2 = sshll.u32 %s3930_s18, 4 }
  0x8e   : > { %3907 = vsyncadd (%p4712_p3), [#allocation7], 4294948864  ;;  %v1131_v2 = vld [vmem:[#allocation8 + $0x200] sm:$0xff]  ;;  %v3177_v3 = vpack.c.bf16 %v421_v1, %v420_v0  ;;  %v1132_v4 = vld [vmem:[#allocation8 + $0x208] sm:$0xff]  ;;  %s4510_s25 = scalar_lea.vmem [#allocation9], %s2369_s23  ;;  %s2378_s9 = sshll.u32 %s3934_s19, 5 }
  0x8f   : > { %v423_v6 = vld [vmem:[#allocation8 + $0x98] sm:$0xff]  ;;  %v3305_v7 = vpack.c.bf16 %v1132_v4, %v1131_v2  ;;  %v1133_v9 = vld [vmem:[#allocation8 + $0x210] sm:$0xff]  ;;  %v424_v11 = vld [vmem:[#allocation8 + $0xa0] sm:$0xff]  ;;  %s4532_s5 = sadd.s32 %s2384_s2, %s2378_s9  ;;  %s2184_s10 = sshll.u32 %s4510_s25, 4  ;;  %s4551_s10 = int_to_ptr.vmem [resolvable:$true] %s2184_s10 }
  0x90   : > { %v3181_v8 = vpack.c.bf16 %v423_v6, %v422_v5  ;;  %v1134_v10 = vld [vmem:[#allocation8 + $0x218] sm:$0xff]  ;;  %3178 = vmatprep.subr.bf16.mxu1 %v3177_v3  ;;  %v425_v13 = vld [vmem:[#allocation8 + $0xa8] sm:$0xff]  ;;  %v1135_v14 = vld [vmem:[#allocation8 + $0x220] sm:$0xff]  ;;  %s2379_s7 = sshll.u32 %s4532_s5, 7  ;;  %s2163_s14 = scalar_lea.sflag [#allocation5], %s4189_s12 }
  0x91   : > { %v3309_v12 = vpack.c.bf16 %v1134_v10, %v1133_v9  ;;  %v1136_v15 = vld [vmem:[#allocation8 + $0x228] sm:$0xff]  ;;  %3306 = vmatprep.subr.bf16.mxu0 %v3305_v7  ;;  %3180 = vmatpush3.bf16.msra.mxu1 %v3177_v3  ;;  %v3185_v16 = vpack.c.bf16 %v425_v13, %v424_v11  ;;  %v426_v18 = vld [vmem:[#allocation8 + $0xb0] sm:$0xff]  ;;  %v427_v19 = vld [vmem:[#allocation8 + $0xb8] sm:$0xff]  ;;  %s4559_s13 = scalar_lea.hbm %s4676_s3, %s2379_s7  ;;  %s3808_s26 = scalar_lea.vmem %s4551_s10, 2048 }
  0x92   : > { %3308 = vmatpush3.bf16.msra.mxu0 %v3305_v7  ;;  %3182 = vmatprep.subr.bf16.mxu1 %v3181_v8  ;;  %v3313_v17 = vpack.c.bf16 %v1136_v15, %v1135_v14  ;;  %v1137_v20 = vld [vmem:[#allocation8 + $0x230] sm:$0xff]  ;;  %v1138_v21 = vld [vmem:[#allocation8 + $0x238] sm:$0xff]  ;;  %v3189_v22 = vpack.c.bf16 %v427_v19, %v426_v18  ;;  %v428_v23 = vld [vmem:[#allocation8 + $0xc0] sm:$0xff]  ;;  %p3809_p7 = scmp.ne.s32.totalorder %s4551_s10, %s3808_s26  ;;  %s3953_s6 = smov [#allocation9]  }
  0x93   : > { %3310 = vmatprep.subr.bf16.mxu0 %v3309_v12  ;;  %v429_v24 = vld [vmem:[#allocation8 + $0xc8] sm:$0xff]  ;;  %v3317_v25 = vpack.c.bf16 %v1138_v21, %v1137_v20  ;;  %v1139_v26 = vld [vmem:[#allocation8 + $0x240] sm:$0xff]  ;;  %v430_v34 = vld [vmem:[#allocation8 + $0xd0] sm:$0xff]  ;;  %s3812_s24 = sshll.u32 %s3953_s6, 4  ;;  %s3813_s24 = int_to_ptr.vmem [resolvable:$false] %s3812_s24 }
  0x94   : > { %v1140_v27 = vld [vmem:[#allocation8 + $0x248] sm:$0xff]  ;;  %v4212_v28 = vld [vmem:[%s4201_s11] sm:$0xff]  ;;  %v310_v32 = vld [vmem:[%s4201_s11 + $0x10] sm:$0x3]  ;;  %v3193_v33 = vpack.c.bf16 %v429_v24, %v428_v23  ;;  %p3810_p1 = pnand %p3809_p7, %p4086_p11  ;;  %s3814_s29 = scalar_lea.vmem %s3813_s24, 4096 }
  0x95   : > { %3184 = vmatpush3.bf16.msra.mxu1 %v3181_v8  ;;  %v4215_v29 = vld [vmem:[%s4201_s11 + $0x8] sm:$0xff]  ;;  %311 = vst [vmem:[#allocation2] sm:$0xff] %v4212_v28  ;;  %v4219_v30 = vld [vmem:[%s4193_s30] sm:$0xff]  ;;  %313 = vst [vmem:[#allocation2 + $0x10] sm:$0x3] %v310_v32  ;;  %v3321_v36 = vpack.c.bf16 %v1140_v27, %v1139_v26  ;;  %p3815_p4 = scmp.lt.s32.totalorder %s4551_s10, %s3813_s24  ;;  %p3816_p9 = scmp.lt.s32.totalorder %s3814_s29, %s3808_s26 }
  0x96   : > { %3312 = vmatpush3.bf16.msra.mxu0 %v3309_v12  ;;  %3186 = vmatprep.subr.bf16.mxu1 %v3185_v16  ;;  %v4222_v31 = vld [vmem:[%s4193_s30 + $0x8] sm:$0xff]  ;;  %312 = vst [vmem:[#allocation2 + $0x8] sm:$0xff] %v4215_v29  ;;  %339 = vst [vmem:[#allocation2 + $0x18] sm:$0xff] %v4219_v30  ;;  %v316_v35 = vld [vmem:[%s4193_s30 + $0x10] sm:$0x3]  ;;  %p3811_p2 = pneg %p3810_p1 }
  0x97   : > { %3314 = vmatprep.subr.bf16.mxu0 %v3313_v17  ;;  %340 = vst [vmem:[#allocation2 + $0x20] sm:$0xff] %v4222_v31  ;;  %v431_v37 = vld [vmem:[#allocation8 + $0xd8] sm:$0xff]  ;;  %341 = vst [vmem:[#allocation2 + $0x28] sm:$0x3] %v316_v35  ;;  %v4233_v39 = vld [vmem:[%s4193_s30 + $0x20] sm:$0xff]  ;;  %p3817_p6 = por %p3816_p9, %p3815_p4 }
  0x98   : > { %v4230_v38 = vld [vmem:[%s4193_s30 + $0x18] sm:$0xff]  ;;  %v1141_v40 = vld [vmem:[#allocation8 + $0x250] sm:$0xff]  ;;  %343 = vst [vmem:[#allocation2 + $0x38] sm:$0xff] %v4233_v39  ;;  %v319_v42 = vld [vmem:[%s4193_s30 + $0x28] sm:$0x3]  ;;  %v3197_v45 = vpack.c.bf16 %v431_v37, %v430_v34 }
  0x99   : > { %3188 = vmatpush3.bf16.msra.mxu1 %v3185_v16  ;;  %v1142_v41 = vld [vmem:[#allocation8 + $0x258] sm:$0xff]  ;;  %342 = vst [vmem:[#allocation2 + $0x30] sm:$0xff] %v4230_v38  ;;  %344 = vst [vmem:[#allocation2 + $0x40] sm:$0x3] %v319_v42  ;;  %v4239_v43 = vld [vmem:[%s4193_s30 + $0x30] sm:$0xff]  ;;  %p3818_p10 = pnand %p3817_p6, %p3811_p2 }
  0x9a   : > { %3316 = vmatpush3.bf16.msra.mxu0 %v3313_v17  ;;  %3190 = vmatprep.subr.bf16.mxu1 %v3189_v22  ;;  %v4242_v44 = vld [vmem:[%s4193_s30 + $0x38] sm:$0xff]  ;;  %v432_v46 = vld [vmem:[#allocation8 + $0xe0] sm:$0xff]  ;;  %v433_v47 = vld [vmem:[#allocation8 + $0xe8] sm:$0xff]  ;;  %345 = vst [vmem:[#allocation2 + $0x48] sm:$0xff] %v4239_v43  ;;  %v3325_v49 = vpack.c.bf16 %v1142_v41, %v1141_v40 }
  0x9b   : > { %3318 = vmatprep.subr.bf16.mxu0 %v3317_v25  ;;  %346 = vst [vmem:[#allocation2 + $0x50] sm:$0xff] %v4242_v44  ;;  %v322_v48 = vld [vmem:[%s4193_s30 + $0x40] sm:$0x3]  ;;  %v1144_v51 = vld [vmem:[#allocation8 + $0x268] sm:$0xff]  ;;  %v4253_v55 = vld [vmem:[%s4193_s30 + $0x50] sm:$0xff]  ;;  %v3201_v56 = vpack.c.bf16 %v433_v47, %v432_v46 }
  0x9c   : > { %v1143_v50 = vld [vmem:[#allocation8 + $0x260] sm:$0xff]  ;;  %347 = vst [vmem:[#allocation2 + $0x58] sm:$0x3] %v322_v48  ;;  %v4248_v52 = vld [vmem:[%s4193_s30 + $0x48] sm:$0xff]  ;;  %349 = vst [vmem:[#allocation2 + $0x68] sm:$0xff] %v4253_v55 }
  0x9d   : > { %3192 = vmatpush3.bf16.msra.mxu1 %v3189_v22  ;;  %v403_v53 = vld [vmem:[#allocation2 + $0x1] sm:$0xff]  ;;  %348 = vst [vmem:[#allocation2 + $0x60] sm:$0xff] %v4248_v52  ;;  %v3329_v58 = vpack.c.bf16 %v1144_v51, %v1143_v50  ;;  %v4260_v61 = vld [vmem:[%s4193_s30 + $0x60] sm:$0xff]  ;;  %v4263_v0 = vld [vmem:[%s4193_s30 + $0x68] sm:$0xff] }
  0x9e   : > { %3320 = vmatpush3.bf16.msra.mxu0 %v3317_v25  ;;  %3194 = vmatprep.subr.bf16.mxu1 %v3193_v33  ;;  %v4250_v54 = vld [vmem:[#allocation2 + $0x19] sm:$0xff]  ;;  %v325_v57 = vld [vmem:[%s4193_s30 + $0x58] sm:$0x3]  ;;  %351 = vst [vmem:[#allocation2 + $0x78] sm:$0xff] %v4260_v61  ;;  %352 = vst [vmem:[#allocation2 + $0x80] sm:$0xff] %v4263_v0 }
  0x9f   : > { %3322 = vmatprep.subr.bf16.mxu0 %v3321_v36  ;;  %2705 = vmatprep.mubr.f32.mxu1 %v403_v53  ;;  %v434_v59 = vld [vmem:[#allocation8 + $0xf0] sm:$0xff]  ;;  %v435_v60 = vld [vmem:[#allocation8 + $0xf8] sm:$0xff]  ;;  %350 = vst [vmem:[#allocation2 + $0x70] sm:$0x3] %v325_v57  ;;  %v387_v3 = vld [vmem:[#allocation8] sm:$0xff] }
  0xa0   : > { %2929 = vmatprep.mubr.f32.mxu0 %v4250_v54  ;;  %v1145_v62 = vld [vmem:[#allocation8 + $0x270] sm:$0xff]  ;;  %v1146_v63 = vld [vmem:[#allocation8 + $0x278] sm:$0xff]  ;;  %v3205_v2 = vpack.c.bf16 %v435_v60, %v434_v59  ;;  %v388_v5 = vld [vmem:[#allocation8 + $0x8] sm:$0xff] }
  0xa1   : > { %3196 = vmatpush3.bf16.msra.mxu1 %v3193_v33  ;;  %v328_v1 = vld [vmem:[%s4193_s30 + $0x70] sm:$0x3]  ;;  %v3333_v4 = vpack.c.bf16 %v1146_v63, %v1145_v62  ;;  %v4269_v6 = vld [vmem:[%s4193_s30 + $0x78] sm:$0xff]  ;;  %v4272_v7 = vld [vmem:[%s4193_s30 + $0x80] sm:$0xff]  ;;  %v3209_v12 = vpack.c.bf16 %v388_v5, %v387_v3 }
  0xa2   : > { %3324 = vmatpush3.bf16.msra.mxu0 %v3321_v36  ;;  %3198 = vmatprep.subr.bf16.mxu1 %v3197_v45  ;;  %353 = vst [vmem:[#allocation2 + $0x88] sm:$0x3] %v328_v1  ;;  %v1325_v8 = vld [vmem:[#allocation8 + $0x280] sm:$0xff]  ;;  %v1326_v9 = vld [vmem:[#allocation8 + $0x288] sm:$0xff]  ;;  %354 = vst [vmem:[#allocation2 + $0x90] sm:$0xff] %v4269_v6 }
  0xa3   : > { %3326 = vmatprep.subr.bf16.mxu0 %v3325_v49  ;;  %355 = vst [vmem:[#allocation2 + $0x98] sm:$0xff] %v4272_v7  ;;  %v331_v10 = vld [vmem:[%s4193_s30 + $0x88] sm:$0x3]  ;;  %v4278_v11 = vld [vmem:[%s4193_s30 + $0x90] sm:$0xff]  ;;  %v4281_v13 = vld [vmem:[%s4193_s30 + $0x98] sm:$0xff]  ;;  %v3337_v14 = vpack.c.bf16 %v1326_v9, %v1325_v8 }
  0xa4   : > { %356 = vst [vmem:[#allocation2 + $0xa0] sm:$0x3] %v331_v10  ;;  %357 = vst [vmem:[#allocation2 + $0xa8] sm:$0xff] %v4278_v11  ;;  %v389_v15 = vld [vmem:[#allocation8 + $0x10] sm:$0xff]  ;;  %v334_v16 = vld [vmem:[%s4193_s30 + $0xa0] sm:$0x3] }
  0xa5   : > { %3200 = vmatpush3.bf16.msra.mxu1 %v3197_v45  ;;  %358 = vst [vmem:[#allocation2 + $0xb0] sm:$0xff] %v4281_v13  ;;  %v390_v17 = vld [vmem:[#allocation8 + $0x18] sm:$0xff]  ;;  %v1327_v18 = vld [vmem:[#allocation8 + $0x290] sm:$0xff]  ;;  %359 = vst [vmem:[#allocation2 + $0xb8] sm:$0x3] %v334_v16 }
  0xa6   : > { %3328 = vmatpush3.bf16.msra.mxu0 %v3325_v49  ;;  %3202 = vmatprep.subr.bf16.mxu1 %v3201_v56  ;;  %v4287_v19 = vld [vmem:[%s4193_s30 + $0xa8] sm:$0xff]  ;;  %v404_v20 = vld [vmem:[#allocation2 + $0x9] sm:$0xff]  ;;  %v4290_v22 = vld [vmem:[%s4193_s30 + $0xb0] sm:$0xff]  ;;  %v3213_v25 = vpack.c.bf16 %v390_v17, %v389_v15 }
  0xa7   : > { %3330 = vmatprep.subr.bf16.mxu0 %v3329_v58  ;;  %v1328_v21 = vld [vmem:[#allocation8 + $0x298] sm:$0xff]  ;;  %360 = vst [vmem:[#allocation2 + $0xc0] sm:$0xff] %v4287_v19  ;;  %361 = vst [vmem:[#allocation2 + $0xc8] sm:$0xff] %v4290_v22  ;;  %v4295_v26 = vld [vmem:[#allocation2 + $0x31] sm:$0xff] }
  0xa8   : > { %v1115_v23 = vld [vmem:[#allocation2 + $0x21] sm:$0xff]  ;;  %v3341_v27 = vpack.c.bf16 %v1328_v21, %v1327_v18  ;;  %v391_v32 = vld [vmem:[#allocation8 + $0x20] sm:$0xff]  ;;  %v392_v33 = vld [vmem:[#allocation8 + $0x28] sm:$0xff] }
  0xa9   : > { %3204 = vmatpush3.bf16.msra.mxu1 %v3201_v56  ;;  %v337_v24 = vld [vmem:[%s4193_s30 + $0xb8] sm:$0x3]  ;;  %v1329_v34 = vld [vmem:[#allocation8 + $0x2a0] sm:$0xff]  ;;  %v1330_v35 = vld [vmem:[#allocation8 + $0x2a8] sm:$0xff]  ;;  %v3217_v37 = vpack.c.bf16 %v392_v33, %v391_v32 }
  0xaa   : > { %3332 = vmatpush3.bf16.msra.mxu0 %v3329_v58  ;;  %3206 = vmatprep.subr.bf16.mxu1 %v3205_v2  ;;  %362 = vst [vmem:[#allocation2 + $0xd0] sm:$0x3] %v337_v24  ;;  %v4298_v36 = vld [vmem:[#allocation2 + $0x39] sm:$0xff]  ;;  %v4301_v40 = vld [vmem:[#allocation2 + $0x49] sm:$0xff]  ;;  %v3345_v41 = vpack.c.bf16 %v1330_v35, %v1329_v34  ;;  %v4305_v48 = vld [vmem:[#allocation2 + $0x51] sm:$0xff] }
  0xab   : > { %3334 = vmatprep.subr.bf16.mxu0 %v3333_v4  ;;  %v393_v42 = vld [vmem:[#allocation8 + $0x30] sm:$0xff]  ;;  %v394_v45 = vld [vmem:[#allocation8 + $0x38] sm:$0xff]  ;;  %v395_v53 = vld [vmem:[#allocation8 + $0x40] sm:$0xff] }
  0xac   : > { %v1331_v46 = vld [vmem:[#allocation8 + $0x2b0] sm:$0xff]  ;;  %v1332_v47 = vld [vmem:[#allocation8 + $0x2b8] sm:$0xff]  ;;  %v3221_v49 = vpack.c.bf16 %v394_v45, %v393_v42  ;;  %v1333_v56 = vld [vmem:[#allocation8 + $0x2c0] sm:$0xff] }
  0xad   : > { %3208 = vmatpush3.bf16.msra.mxu1 %v3205_v2  ;;  %v4309_v50 = vld [vmem:[#allocation2 + $0x61] sm:$0xff]  ;;  %v3349_v51 = vpack.c.bf16 %v1332_v47, %v1331_v46  ;;  %v1334_v57 = vld [vmem:[#allocation8 + $0x2c8] sm:$0xff]  ;;  %v4313_v58 = vld [vmem:[#allocation2 + $0x69] sm:$0xff] }
  0xae   : > { %3336 = vmatpush3.bf16.msra.mxu0 %v3333_v4  ;;  %3210 = vmatprep.subr.bf16.mxu1 %v3209_v12  ;;  %v4317_v60 = vld [vmem:[#allocation2 + $0x79] sm:$0xff]  ;;  %v3353_v62 = vpack.c.bf16 %v1334_v57, %v1333_v56  ;;  %v398_v1 = vld [vmem:[#allocation8 + $0x58] sm:$0xff]  ;;  %v4325_v8 = vld [vmem:[#allocation2 + $0x91] sm:$0xff] }
  0xaf   : > { %3338 = vmatprep.subr.bf16.mxu0 %v3337_v14  ;;  %v397_v63 = vld [vmem:[#allocation8 + $0x50] sm:$0xff]  ;;  %v1336_v3 = vld [vmem:[#allocation8 + $0x2d8] sm:$0xff]  ;;  %v399_v10 = vld [vmem:[#allocation8 + $0x60] sm:$0xff] }
  0xb0   : > { %2706 = vmatmul.mubr.f32.vlgmr.msra.gmra.mrb[0].mxu1 %v404_v20  ;;  %v1335_v2 = vld [vmem:[#allocation8 + $0x2d0] sm:$0xff]  ;;  %v3229_v5 = vpack.c.bf16 %v398_v1, %v397_v63  ;;  %v1338_v15 = vld [vmem:[#allocation8 + $0x2e8] sm:$0xff]  ;;  %v4333_v18 = vld [vmem:[#allocation2 + $0xa9] sm:$0xff] }
  0xb1   : > { %2930 = vmatmul.mubr.f32.vlgmr.msra.gmra.mrb[0].mxu0 %v1115_v23  ;;  %3212 = vmatpush3.bf16.msra.mxu1 %v3209_v12  ;;  %v4321_v4 = vld [vmem:[#allocation2 + $0x81] sm:$0xff]  ;;  %v3357_v9 = vpack.c.bf16 %v1336_v3, %v1335_v2  ;;  %v400_v12 = vld [vmem:[#allocation8 + $0x68] sm:$0xff]  ;;  %v743_v35 = vld [vmem:[#allocation8 + $0x100] sm:$0xff] }
  0xb2   : > { %3340 = vmatpush3.bf16.msra.mxu0 %v3337_v14  ;;  %2708 = vmatprep.mubr.f32.mxu1 %v4250_v54  ;;  %v396_v54 = vld [vmem:[#allocation8 + $0x48] sm:$0xff]  ;;  %v1337_v14 = vld [vmem:[#allocation8 + $0x2e0] sm:$0xff]  ;;  %v3233_v17 = vpack.c.bf16 %v400_v12, %v399_v10  ;;  %v401_v21 = vld [vmem:[#allocation8 + $0x70] sm:$0xff] }
  0xb3   : > { %2932 = vmatprep.mubr.f32.mxu0 %v4295_v26  ;;  %3214 = vmatprep.subr.bf16.mxu1 %v3213_v25  ;;  %v3225_v59 = vpack.c.bf16 %v396_v54, %v395_v53  ;;  %v4329_v16 = vld [vmem:[#allocation2 + $0x99] sm:$0xff]  ;;  %v3361_v20 = vpack.c.bf16 %v1338_v15, %v1337_v14  ;;  %v4341_v33 = vld [vmem:[#allocation2 + $0xc1] sm:$0xff]  ;;  %v4345_v45 = vld [vmem:[#allocation2 + $0xc9] sm:$0xff] }
  0xb4   : > { %2709 = vmatmul.mubr.f32.gmra.mrb[2].mxu1 %v1115_v23  ;;  %3342 = vmatprep.subr.bf16.mxu0 %v3341_v27  ;;  %v402_v23 = vld [vmem:[#allocation8 + $0x78] sm:$0xff]  ;;  %v1339_v24 = vld [vmem:[#allocation8 + $0x2f0] sm:$0xff]  ;;  %v1521_v42 = vld [vmem:[#allocation8 + $0x308] sm:$0xff] }
  0xb5   : > { %2933 = vmatmul.mubr.f32.gmra.mrb[2].mxu0 %v4298_v36  ;;  %3216 = vmatpush3.bf16.msra.mxu1 %v3213_v25  ;;  %v1340_v25 = vld [vmem:[#allocation8 + $0x2f8] sm:$0xff]  ;;  %v3237_v32 = vpack.c.bf16 %v402_v23, %v401_v21  ;;  %v4348_v46 = vld [vmem:[#allocation2 + $0x1a] sm:$0xff]  ;;  %v4365_v1 = vld [vmem:[#allocation2 + $0x32] sm:$0xff] }
  0xb6   : > { %3344 = vmatpush3.bf16.msra.mxu0 %v3341_v27  ;;  %2711 = vmatprep.mubr.f32.mxu1 %v4295_v26  ;;  %v4337_v27 = vld [vmem:[#allocation2 + $0xb1] sm:$0xff]  ;;  %v3365_v34 = vpack.c.bf16 %v1340_v25, %v1339_v24  ;;  %v745_v53 = vld [vmem:[#allocation8 + $0x110] sm:$0xff]  ;;  %v746_v54 = vld [vmem:[#allocation8 + $0x118] sm:$0xff] }
  0xb7   : > { %2935 = vmatprep.mubr.f32.mxu0 %v4301_v40  ;;  %3218 = vmatprep.subr.bf16.mxu1 %v3217_v37  ;;  %v4356_v56 = vld [vmem:[%s4201_s11 + $0x20] sm:$0xff]  ;;  %v3245_v63 = vpack.c.bf16 %v746_v54, %v745_v53  ;;  %v2373_v12 = vld [vmem:[%s4201_s11 + $0x28] sm:$0x3] }
  0xb8   : > { %2712 = vmatmul.mubr.f32.gmra.mrb[4].mxu1 %v4298_v36  ;;  %3346 = vmatprep.subr.bf16.mxu0 %v3345_v41  ;;  %v1522_v57 = vld [vmem:[#allocation8 + $0x310] sm:$0xff]  ;;  %369 = vst [vmem:[#allocation2 + $0xe0] sm:$0xff] %v4356_v56  ;;  %v747_v3 = vld [vmem:[#allocation8 + $0x120] sm:$0xff]  ;;  %370 = vst [vmem:[#allocation2 + $0xe8] sm:$0x3] %v2373_v12 }
  0xb9   : > { %2936 = vmatmul.mubr.f32.gmra.mrb[4].mxu0 %v4305_v48  ;;  %3220 = vmatpush3.bf16.msra.mxu1 %v3217_v37  ;;  %v744_v37 = vld [vmem:[#allocation8 + $0x108] sm:$0xff]  ;;  %v4374_v14 = vld [vmem:[#allocation2 + $0x4a] sm:$0xff]  ;;  %v1526_v21 = vld [vmem:[#allocation8 + $0x330] sm:$0xff] }
  0xba   : > { %3348 = vmatpush3.bf16.msra.mxu0 %v3345_v41  ;;  %2714 = vmatprep.mubr.f32.mxu1 %v4301_v40  ;;  %v1520_v41 = vld [vmem:[#allocation8 + $0x300] sm:$0xff]  ;;  %v3241_v47 = vpack.c.bf16 %v744_v37, %v743_v35  ;;  %v4369_v10 = vld [vmem:[#allocation2 + $0x3a] sm:$0xff]  ;;  %v1527_v23 = vld [vmem:[#allocation8 + $0x338] sm:$0xff] }
  0xbb   : > { %2938 = vmatprep.mubr.f32.mxu0 %v4309_v50  ;;  %3222 = vmatprep.subr.bf16.mxu1 %v3221_v49  ;;  %v4378_v24 = vld [vmem:[#allocation2 + $0x52] sm:$0xff]  ;;  %v4390_v53 = vld [vmem:[#allocation2 + $0x7a] sm:$0xff] }
  0xbc   : > { %2715 = vmatmul.mubr.f32.gmra.mrb[6].mxu1 %v4305_v48  ;;  %3350 = vmatprep.subr.bf16.mxu0 %v3349_v51  ;;  %v751_v35 = vld [vmem:[#allocation8 + $0x140] sm:$0xff]  ;;  %v752_v37 = vld [vmem:[#allocation8 + $0x148] sm:$0xff] }
  0xbd   : > { %2939 = vmatmul.mubr.f32.gmra.mrb[6].mxu0 %v4313_v58  ;;  %3224 = vmatpush3.bf16.msra.mxu1 %v3221_v49  ;;  %v4351_v49 = vld [vmem:[%s4201_s11 + $0x18] sm:$0xff]  ;;  %v755_v12 = vld [vmem:[#allocation8 + $0x160] sm:$0xff] }
  0xbe   : > { %3352 = vmatpush3.bf16.msra.mxu0 %v3349_v51  ;;  %2717 = vmatprep.mubr.f32.mxu1 %v4309_v50  ;;  %v3369_v51 = vpack.c.bf16 %v1521_v42, %v1520_v41  ;;  %368 = vst [vmem:[#allocation2 + $0xd8] sm:$0xff] %v4351_v49  ;;  %v1528_v41 = vld [vmem:[#allocation8 + $0x340] sm:$0xff]  ;;  %v1529_v42 = vld [vmem:[#allocation8 + $0x348] sm:$0xff] }
  0xbf   : > { %2941 = vmatprep.mubr.f32.mxu0 %v4317_v60  ;;  %3226 = vmatprep.subr.bf16.mxu1 %v3225_v59  ;;  %v3385_v54 = vpack.c.bf16 %v1529_v42, %v1528_v41  ;;  %v1535_v41 = vld [vmem:[#allocation8 + $0x378] sm:$0xff]  ;;  %v4410_v42 = vld [vmem:[#allocation2 + $0xb2] sm:$0xff] }
  0xc0   : > { %2718 = vmatmul.mubr.f32.gmra.mrb[8].mxu1 %v4313_v58  ;;  %3354 = vmatprep.subr.bf16.mxu0 %v3353_v62 }
  0xc1   : > { %2942 = vmatmul.mubr.f32.gmra.mrb[8].mxu0 %v4321_v4  ;;  %3228 = vmatpush3.bf16.msra.mxu1 %v3225_v59  ;;  %v1523_v59 = vld [vmem:[#allocation8 + $0x318] sm:$0xff] }
  0xc2   : > { %3356 = vmatpush3.bf16.msra.mxu0 %v3353_v62  ;;  %2720 = vmatprep.mubr.f32.mxu1 %v4317_v60  ;;  %v4361_v62 = vld [vmem:[#allocation2 + $0x22] sm:$0xff]  ;;  %v3373_v2 = vpack.c.bf16 %v1523_v59, %v1522_v57 }
  0xc3   : > { %2944 = vmatprep.mubr.f32.mxu0 %v4325_v8  ;;  %3230 = vmatprep.subr.bf16.mxu1 %v3229_v5  ;;  %v753_v57 = vld [vmem:[#allocation8 + $0x150] sm:$0xff]  ;;  %v754_v59 = vld [vmem:[#allocation8 + $0x158] sm:$0xff] }
  0xc4   : > { %2721 = vmatmul.mubr.f32.gmra.mrb[10].mxu1 %v4321_v4  ;;  %3358 = vmatprep.subr.bf16.mxu0 %v3357_v9 }
  0xc5   : > { %2945 = vmatmul.mubr.f32.gmra.mrb[10].mxu0 %v4329_v16  ;;  %3232 = vmatpush3.bf16.msra.mxu1 %v3229_v5  ;;  %v748_v5 = vld [vmem:[#allocation8 + $0x128] sm:$0xff] }
  0xc6   : > { %3360 = vmatpush3.bf16.msra.mxu0 %v3357_v9  ;;  %2723 = vmatprep.mubr.f32.mxu1 %v4325_v8  ;;  %v1524_v9 = vld [vmem:[#allocation8 + $0x320] sm:$0xff] }
  0xc7   : > { %2947 = vmatprep.mubr.f32.mxu0 %v4333_v18  ;;  %3234 = vmatprep.subr.bf16.mxu1 %v3233_v17 }
  0xc8   : > { %2724 = vmatmul.mubr.f32.gmra.mrb[12].mxu1 %v4329_v16  ;;  %3362 = vmatprep.subr.bf16.mxu0 %v3361_v20 }
  0xc9   : > { %2948 = vmatmul.mubr.f32.gmra.mrb[12].mxu0 %v4337_v27  ;;  %3236 = vmatpush3.bf16.msra.mxu1 %v3233_v17  ;;  %v749_v17 = vld [vmem:[#allocation8 + $0x130] sm:$0xff] }
  0xca   : > { %3364 = vmatpush3.bf16.msra.mxu0 %v3361_v20  ;;  %2726 = vmatprep.mubr.f32.mxu1 %v4333_v18  ;;  %v750_v20 = vld [vmem:[#allocation8 + $0x138] sm:$0xff] }
  0xcb   : > { %2950 = vmatprep.mubr.f32.mxu0 %v4341_v33  ;;  %3238 = vmatprep.subr.bf16.mxu1 %v3237_v32  ;;  %v3253_v25 = vpack.c.bf16 %v750_v20, %v749_v17  ;;  %v1533_v17 = vld [vmem:[#allocation8 + $0x368] sm:$0xff] }
  0xcc   : > { %2727 = vmatmul.mubr.f32.gmra.mrb[14].mxu1 %v4337_v27  ;;  %3366 = vmatprep.subr.bf16.mxu0 %v3365_v34  ;;  %v4402_v20 = vld [vmem:[#allocation2 + $0x9a] sm:$0xff] }
  0xcd   : > { %2951 = vmatmul.mubr.f32.gmra.mrb[14].mxu0 %v4345_v45  ;;  %3240 = vmatpush3.bf16.msra.mxu1 %v3237_v32  ;;  %v4382_v32 = vld [vmem:[#allocation2 + $0x62] sm:$0xff] }
  0xce   : > { %3368 = vmatpush3.bf16.msra.mxu0 %v3365_v34  ;;  %2761 = vmatprep.mubr.f32.mxu1 %v4212_v28  ;;  %v1525_v28 = vld [vmem:[#allocation8 + $0x328] sm:$0xff]  ;;  %v3381_v34 = vpack.c.bf16 %v1527_v23, %v1526_v21  ;;  %v4406_v23 = vld [vmem:[#allocation2 + $0xaa] sm:$0xff] }
  0xcf   : > { %2985 = vmatprep.mubr.f32.mxu0 %v4348_v46  ;;  %3242 = vmatprep.subr.bf16.mxu1 %v3241_v47  ;;  %v3377_v15 = vpack.c.bf16 %v1525_v28, %v1524_v9  ;;  %v4398_v9 = vld [vmem:[#allocation2 + $0x92] sm:$0xff] }
  0xd0   : > { %2762 = vmatmul.mubr.f32.vlgmr.msra.gmra.mrb[0].mxu1 %v4215_v29  ;;  %3370 = vmatprep.subr.bf16.mxu0 %v3369_v51  ;;  %v3249_v29 = vpack.c.bf16 %v748_v5, %v747_v3  ;;  %v4394_v3 = vld [vmem:[#allocation2 + $0x82] sm:$0xff]  ;;  %v3261_v5 = vpack.c.bf16 %v754_v59, %v753_v57  ;;  %v937_v59 = vld [vmem:[#allocation8 + $0x180] sm:$0xff] }
  0xd1   : > { %2986 = vmatmul.mubr.f32.vlgmr.msra.gmra.mrb[0].mxu0 %v4361_v62  ;;  %3244 = vmatpush3.bf16.msra.mxu1 %v3241_v47  ;;  %v4386_v47 = vld [vmem:[#allocation2 + $0x6a] sm:$0xff] }
  0xd2   : > { %3372 = vmatpush3.bf16.msra.mxu0 %v3369_v51  ;;  %2764 = vmatprep.mubr.f32.mxu1 %v4219_v30  ;;  %v3257_v51 = vpack.c.bf16 %v752_v37, %v751_v35  ;;  %v758_v35 = vld [vmem:[#allocation8 + $0x178] sm:$0xff]  ;;  %v1534_v37 = vld [vmem:[#allocation8 + $0x370] sm:$0xff] }
  0xd3   : > { %2988 = vmatprep.mubr.f32.mxu0 %v4365_v1  ;;  %3246 = vmatprep.subr.bf16.mxu1 %v3245_v63  ;;  %v3397_v57 = vpack.c.bf16 %v1535_v41, %v1534_v37 }
  0xd4   : > { %2765 = vmatmul.mubr.f32.gmra.mrb[2].mxu1 %v4222_v31  ;;  %3374 = vmatprep.subr.bf16.mxu0 %v3373_v2 }
  0xd5   : > { %2989 = vmatmul.mubr.f32.gmra.mrb[2].mxu0 %v4369_v10  ;;  %3248 = vmatpush3.bf16.msra.mxu1 %v3245_v63  ;;  %v1530_v63 = vld [vmem:[#allocation8 + $0x350] sm:$0xff] }
  0xd6   : > { %3376 = vmatpush3.bf16.msra.mxu0 %v3373_v2  ;;  %2767 = vmatprep.mubr.f32.mxu1 %v4230_v38  ;;  %v1531_v2 = vld [vmem:[#allocation8 + $0x358] sm:$0xff] }
  0xd7   : > { %2991 = vmatprep.mubr.f32.mxu0 %v4374_v14  ;;  %3250 = vmatprep.subr.bf16.mxu1 %v3249_v29  ;;  %v3389_v28 = vpack.c.bf16 %v1531_v2, %v1530_v63  ;;  %v938_v63 = vld [vmem:[#allocation8 + $0x188] sm:$0xff]  ;;  %v1714_v2 = vld [vmem:[#allocation8 + $0x380] sm:$0xff] }
  0xd8   : > { %2768 = vmatmul.mubr.f32.gmra.mrb[4].mxu1 %v4233_v39  ;;  %3378 = vmatprep.subr.bf16.mxu0 %v3377_v15 }
  0xd9   : > { %2992 = vmatmul.mubr.f32.gmra.mrb[4].mxu0 %v4378_v24  ;;  %3252 = vmatpush3.bf16.msra.mxu1 %v3249_v29  ;;  %v756_v29 = vld [vmem:[#allocation8 + $0x168] sm:$0xff] }
  0xda   : > { %3380 = vmatpush3.bf16.msra.mxu0 %v3377_v15  ;;  %2770 = vmatprep.mubr.f32.mxu1 %v4239_v43  ;;  %v1532_v15 = vld [vmem:[#allocation8 + $0x360] sm:$0xff]  ;;  %v3265_v21 = vpack.c.bf16 %v756_v29, %v755_v12  ;;  %v726_v12 = vld [vmem:[#allocation2 + $0x2] sm:$0xff]  ;;  %v3273_v29 = vpack.c.bf16 %v938_v63, %v937_v59  ;;  %v942_v63 = vld [vmem:[#allocation8 + $0x1a8] sm:$0xff] }
  0xdb   : > { %2994 = vmatprep.mubr.f32.mxu0 %v4382_v32  ;;  %3254 = vmatprep.subr.bf16.mxu1 %v3253_v25  ;;  %v941_v59 = vld [vmem:[#allocation8 + $0x1a0] sm:$0xff] }
  0xdc   : > { %2771 = vmatmul.mubr.f32.gmra.mrb[6].mxu1 %v4242_v44  ;;  %3382 = vmatprep.subr.bf16.mxu0 %v3381_v34 }
  0xdd   : > { %2995 = vmatmul.mubr.f32.gmra.mrb[6].mxu0 %v4386_v47  ;;  %3256 = vmatpush3.bf16.msra.mxu1 %v3253_v25  ;;  %v3393_v25 = vpack.c.bf16 %v1533_v17, %v1532_v15  ;;  %v939_v17 = vld [vmem:[#allocation8 + $0x190] sm:$0xff] }
  0xde   : > { %3384 = vmatpush3.bf16.msra.mxu0 %v3381_v34  ;;  %2773 = vmatprep.mubr.f32.mxu1 %v4248_v52  ;;  %v757_v34 = vld [vmem:[#allocation8 + $0x170] sm:$0xff] }
  0xdf   : > { %2997 = vmatprep.mubr.f32.mxu0 %v4390_v53  ;;  %3258 = vmatprep.subr.bf16.mxu1 %v3257_v51 }
  0xe0   : > { %2774 = vmatmul.mubr.f32.gmra.mrb[8].mxu1 %v4253_v55  ;;  %3386 = vmatprep.subr.bf16.mxu0 %v3385_v54 }
  0xe1   : > { %2998 = vmatmul.mubr.f32.gmra.mrb[8].mxu0 %v4394_v3  ;;  %3260 = vmatpush3.bf16.msra.mxu1 %v3257_v51  ;;  %v3269_v51 = vpack.c.bf16 %v758_v35, %v757_v34  ;;  %v940_v34 = vld [vmem:[#allocation8 + $0x198] sm:$0xff] }
  0xe2   : > { %3388 = vmatpush3.bf16.msra.mxu0 %v3385_v54  ;;  %2776 = vmatprep.mubr.f32.mxu1 %v4260_v61  ;;  %v4414_v54 = vld [vmem:[#allocation2 + $0xc2] sm:$0xff]  ;;  %v3277_v37 = vpack.c.bf16 %v940_v34, %v939_v17 }
  0xe3   : > { %3000 = vmatprep.mubr.f32.mxu0 %v4398_v9  ;;  %3262 = vmatprep.subr.bf16.mxu1 %v3261_v5  ;;  %v1717_v35 = vld [vmem:[#allocation8 + $0x398] sm:$0xff]  ;;  %v1720_v34 = vld [vmem:[#allocation8 + $0x3b0] sm:$0xff] }
  0xe4   : > { %2777 = vmatmul.mubr.f32.gmra.mrb[10].mxu1 %v4263_v0  ;;  %3390 = vmatprep.subr.bf16.mxu0 %v3389_v28  ;;  %v944_v17 = vld [vmem:[#allocation8 + $0x1b8] sm:$0xff] }
  0xe5   : > { %3001 = vmatmul.mubr.f32.gmra.mrb[10].mxu0 %v4402_v20  ;;  %3264 = vmatpush3.bf16.msra.mxu1 %v3261_v5  ;;  %v1715_v5 = vld [vmem:[#allocation8 + $0x388] sm:$0xff] }
  0xe6   : > { %3392 = vmatpush3.bf16.msra.mxu0 %v3389_v28  ;;  %2779 = vmatprep.mubr.f32.mxu1 %v4269_v6  ;;  %v4418_v28 = vld [vmem:[#allocation2 + $0xca] sm:$0xff]  ;;  %v3401_v15 = vpack.c.bf16 %v1715_v5, %v1714_v2  ;;  %v1719_v5 = vld [vmem:[#allocation8 + $0x3a8] sm:$0xff] }
  0xe7   : > { %3003 = vmatprep.mubr.f32.mxu0 %v4406_v23  ;;  %3266 = vmatprep.subr.bf16.mxu1 %v3265_v21  ;;  %v1718_v2 = vld [vmem:[#allocation8 + $0x3a0] sm:$0xff] }
  0xe8   : > { %2780 = vmatmul.mubr.f32.gmra.mrb[12].mxu1 %v4272_v7  ;;  %3394 = vmatprep.subr.bf16.mxu0 %v3393_v25 }
  0xe9   : > { %3004 = vmatmul.mubr.f32.gmra.mrb[12].mxu0 %v4410_v42  ;;  %3268 = vmatpush3.bf16.msra.mxu1 %v3265_v21  ;;  %v727_v21 = vld [vmem:[#allocation2 + $0xa] sm:$0xff] }
  0xea   : > { %3396 = vmatpush3.bf16.msra.mxu0 %v3393_v25  ;;  %2782 = vmatprep.mubr.f32.mxu1 %v4278_v11  ;;  %v1716_v25 = vld [vmem:[#allocation8 + $0x390] sm:$0xff] }
  0xeb   : > { %3006 = vmatprep.mubr.f32.mxu0 %v4414_v54  ;;  %3270 = vmatprep.subr.bf16.mxu1 %v3269_v51  ;;  %v3405_v41 = vpack.c.bf16 %v1717_v35, %v1716_v25  ;;  %v1722_v25 = vld [vmem:[#allocation8 + $0x3c0] sm:$0xff]  ;;  %v1723_v35 = vld [vmem:[#allocation8 + $0x3c8] sm:$0xff] }
  0xec   : > { %2783 = vmatmul.mubr.f32.gmra.mrb[14].mxu1 %v4281_v13  ;;  %3398 = vmatprep.subr.bf16.mxu0 %v3397_v57 }
  0xed   : > { %3007 = vmatmul.mubr.f32.gmra.mrb[14].mxu0 %v4418_v28  ;;  %3272 = vmatpush3.bf16.msra.mxu1 %v3269_v51  ;;  %v3281_v51 = vpack.c.bf16 %v942_v63, %v941_v59  ;;  %v947_v59 = vld [vmem:[#allocation8 + $0x1d0] sm:$0xff]  ;;  %v948_v63 = vld [vmem:[#allocation8 + $0x1d8] sm:$0xff] }
  0xee   : > { %3400 = vmatpush3.bf16.msra.mxu0 %v3397_v57  ;;  %2817 = vmatprep.mubr.f32.mxu1 %v726_v12  ;;  %v3409_v57 = vpack.c.bf16 %v1719_v5, %v1718_v2  ;;  %v943_v12 = vld [vmem:[#allocation8 + $0x1b0] sm:$0xff]  ;;  %v1725_v5 = vld [vmem:[#allocation8 + $0x3d8] sm:$0xff] }
  0xef   : > { %3041 = vmatprep.mubr.f32.mxu0 %v4230_v38  ;;  %3274 = vmatprep.subr.bf16.mxu1 %v3273_v29  ;;  %v1724_v2 = vld [vmem:[#allocation8 + $0x3d0] sm:$0xff] }
  0xf0   : > { %2818 = vmatmul.mubr.f32.vlgmr.msra.gmra.mrb[0].mxu1 %v727_v21  ;;  %3402 = vmatprep.subr.bf16.mxu0 %v3401_v15  ;;  %v946_v21 = vld [vmem:[#allocation8 + $0x1c8] sm:$0xff] }
  0xf1   : > { %3042 = vmatmul.mubr.f32.vlgmr.msra.gmra.mrb[0].mxu0 %v4233_v39  ;;  %3276 = vmatpush3.bf16.msra.mxu1 %v3273_v29  ;;  %v1721_v29 = vld [vmem:[#allocation8 + $0x3b8] sm:$0xff] }
  0xf2   : > { %3404 = vmatpush3.bf16.msra.mxu0 %v3401_v15  ;;  %2820 = vmatprep.mubr.f32.mxu1 %v4348_v46  ;;  %v3285_v46 = vpack.c.bf16 %v944_v17, %v943_v12  ;;  %v945_v15 = vld [vmem:[#allocation8 + $0x1c0] sm:$0xff]  ;;  %v950_v17 = vld [vmem:[#allocation8 + $0x1e8] sm:$0xff] }
  0xf3   : > { %3044 = vmatprep.mubr.f32.mxu0 %v4239_v43  ;;  %3278 = vmatprep.subr.bf16.mxu1 %v3277_v37  ;;  %v949_v12 = vld [vmem:[#allocation8 + $0x1e0] sm:$0xff] }
  0xf4   : > { %2821 = vmatmul.mubr.f32.gmra.mrb[2].mxu1 %v4361_v62  ;;  %3406 = vmatprep.subr.bf16.mxu0 %v3405_v41  ;;  %v3413_v62 = vpack.c.bf16 %v1721_v29, %v1720_v34  ;;  %v1726_v34 = vld [vmem:[#allocation8 + $0x3e0] sm:$0xff]  ;;  %v1727_v29 = vld [vmem:[#allocation8 + $0x3e8] sm:$0xff] }
  0xf5   : > { %3045 = vmatmul.mubr.f32.gmra.mrb[2].mxu0 %v4242_v44  ;;  %3280 = vmatpush3.bf16.msra.mxu1 %v3277_v37  ;;  %v3289_v37 = vpack.c.bf16 %v946_v21, %v945_v15  ;;  %v951_v15 = vld [vmem:[#allocation8 + $0x1f0] sm:$0xff]  ;;  %v952_v21 = vld [vmem:[#allocation8 + $0x1f8] sm:$0xff] }
  0xf6   : > { %3408 = vmatpush3.bf16.msra.mxu0 %v3405_v41  ;;  %2823 = vmatprep.mubr.f32.mxu1 %v4365_v1  ;;  %v3417_v41 = vpack.c.bf16 %v1723_v35, %v1722_v25  ;;  %v1728_v25 = vld [vmem:[#allocation8 + $0x3f0] sm:$0xff]  ;;  %v1729_v35 = vld [vmem:[#allocation8 + $0x3f8] sm:$0xff] }
  0xf7   : > { %3047 = vmatprep.mubr.f32.mxu0 %v4248_v52  ;;  %3282 = vmatprep.subr.bf16.mxu1 %v3281_v51 }
  0xf8   : > { %2824 = vmatmul.mubr.f32.gmra.mrb[4].mxu1 %v4369_v10  ;;  %3410 = vmatprep.subr.bf16.mxu0 %v3409_v57 }
  0xf9   : > { %3048 = vmatmul.mubr.f32.gmra.mrb[4].mxu0 %v4253_v55  ;;  %3284 = vmatpush3.bf16.msra.mxu1 %v3281_v51  ;;  %v3293_v51 = vpack.c.bf16 %v948_v63, %v947_v59  ;;  %v1908_v59 = vld [vmem:[#allocation8 + $0x400] sm:$0xff]  ;;  %v1909_v63 = vld [vmem:[#allocation8 + $0x408] sm:$0xff] }
  0xfa   : > { %3412 = vmatpush3.bf16.msra.mxu0 %v3409_v57  ;;  %2826 = vmatprep.mubr.f32.mxu1 %v4374_v14  ;;  %v3421_v57 = vpack.c.bf16 %v1725_v5, %v1724_v2  ;;  %v3433_v2 = vpack.c.bf16 %v1909_v63, %v1908_v59  ;;  %v1910_v5 = vld [vmem:[#allocation8 + $0x410] sm:$0xff] }
  0xfb   : > { %3050 = vmatprep.mubr.f32.mxu0 %v4260_v61  ;;  %3286 = vmatprep.subr.bf16.mxu1 %v3285_v46 }
  0xfc   : > { %2827 = vmatmul.mubr.f32.gmra.mrb[6].mxu1 %v4378_v24  ;;  %3414 = vmatprep.subr.bf16.mxu0 %v3413_v62 }
  0xfd   : > { %3051 = vmatmul.mubr.f32.gmra.mrb[6].mxu0 %v4263_v0  ;;  %3288 = vmatpush3.bf16.msra.mxu1 %v3285_v46  ;;  %v3297_v46 = vpack.c.bf16 %v950_v17, %v949_v12  ;;  %v1913_v12 = vld [vmem:[#allocation8 + $0x428] sm:$0xff] }
  0xfe   : > { %3416 = vmatpush3.bf16.msra.mxu0 %v3413_v62  ;;  %2829 = vmatprep.mubr.f32.mxu1 %v4382_v32  ;;  %v3425_v62 = vpack.c.bf16 %v1727_v29, %v1726_v34 }
  0xff   : > { %3053 = vmatprep.mubr.f32.mxu0 %v4269_v6  ;;  %3290 = vmatprep.subr.bf16.mxu1 %v3289_v37 }
 0x100   : > { %2830 = vmatmul.mubr.f32.gmra.mrb[8].mxu1 %v4386_v47  ;;  %3418 = vmatprep.subr.bf16.mxu0 %v3417_v41 }
 0x101   : > { %3054 = vmatmul.mubr.f32.gmra.mrb[8].mxu0 %v4272_v7  ;;  %3292 = vmatpush3.bf16.msra.mxu1 %v3289_v37  ;;  %v3301_v37 = vpack.c.bf16 %v952_v21, %v951_v15 }
 0x102   : > { %3420 = vmatpush3.bf16.msra.mxu0 %v3417_v41  ;;  %2832 = vmatprep.mubr.f32.mxu1 %v4390_v53  ;;  %v3429_v41 = vpack.c.bf16 %v1729_v35, %v1728_v25 }
 0x103   : > { %3056 = vmatprep.mubr.f32.mxu0 %v4278_v11  ;;  %3294 = vmatprep.subr.bf16.mxu1 %v3293_v51 }
 0x104   : > { %2833 = vmatmul.mubr.f32.gmra.mrb[10].mxu1 %v4394_v3  ;;  %3422 = vmatprep.subr.bf16.mxu0 %v3421_v57 }
 0x105   : > { %3057 = vmatmul.mubr.f32.gmra.mrb[10].mxu0 %v4281_v13  ;;  %3296 = vmatpush3.bf16.msra.mxu1 %v3293_v51  ;;  %v1911_v51 = vld [vmem:[#allocation8 + $0x418] sm:$0xff] }
 0x106   : > { %3424 = vmatpush3.bf16.msra.mxu0 %v3421_v57  ;;  %2835 = vmatprep.mubr.f32.mxu1 %v4398_v9  ;;  %v3437_v57 = vpack.c.bf16 %v1911_v51, %v1910_v5 }
 0x107   : > { %3059 = vmatprep.mubr.f32.mxu0 %v4287_v19  ;;  %3298 = vmatprep.subr.bf16.mxu1 %v3297_v46 }
 0x108   : > { %2836 = vmatmul.mubr.f32.gmra.mrb[12].mxu1 %v4402_v20  ;;  %3426 = vmatprep.subr.bf16.mxu0 %v3425_v62 }
 0x109   : > { %3060 = vmatmul.mubr.f32.gmra.mrb[12].mxu0 %v4290_v22  ;;  %3300 = vmatpush3.bf16.msra.mxu1 %v3297_v46 }
 0x10a   : > { %3428 = vmatpush3.bf16.msra.mxu0 %v3425_v62  ;;  %2838 = vmatprep.mubr.f32.mxu1 %v4406_v23 }
 0x10b   : > { %3062 = vmatprep.mubr.f32.mxu0 %v4351_v49  ;;  %3302 = vmatprep.subr.bf16.mxu1 %v3301_v37  ;;  %v1912_v49 = vld [vmem:[#allocation8 + $0x420] sm:$0xff] }
 0x10c   : > { %2839 = vmatmul.mubr.f32.gmra.mrb[14].mxu1 %v4410_v42  ;;  %3430 = vmatprep.subr.bf16.mxu0 %v3429_v41 }
 0x10d   : > { %3063 = vmatmul.mubr.f32.gmra.mrb[14].mxu0 %v4356_v56  ;;  %3304 = vmatpush3.bf16.msra.mxu1 %v3301_v37  ;;  %v3441_v56 = vpack.c.bf16 %v1913_v12, %v1912_v49 }
 0x10e   : > { %3432 = vmatpush3.bf16.msra.mxu0 %v3429_v41  ;;  %2873 = vmatprep.mubr.f32.mxu1 %v4219_v30  ;;  %v1914_v30 = vld [vmem:[#allocation8 + $0x430] sm:$0xff] }
 0x10f   : > { %3097 = vmatprep.mubr.f32.mxu0 %v4295_v26  ;;  %3434 = vmatprep.subr.bf16.mxu0 %v3433_v2  ;;  %v1915_v26 = vld [vmem:[#allocation8 + $0x438] sm:$0xff] }
 0x110   : > { %2874 = vmatmul.mubr.f32.vlgmr.msra.gmra.mrb[0].mxu1 %v4222_v31  ;;  %3465 = vmatprep.subr.bf16.mxu1 %v3433_v2  ;;  %v3445_v31 = vpack.c.bf16 %v1915_v26, %v1914_v30 }
 0x111   : > { %3098 = vmatmul.mubr.f32.vlgmr.msra.gmra.mrb[0].mxu0 %v4298_v36  ;;  %3473 = vmatpush3.bf16.msra.mxu1 %v3433_v2  ;;  %v1917_v36 = vld [vmem:[#allocation8 + $0x448] sm:$0xff] }
 0x112   : > { %3436 = vmatpush3.bf16.msra.mxu0 %v3433_v2  ;;  %2876 = vmatprep.mubr.f32.mxu1 %v4230_v38  ;;  %v1916_v38 = vld [vmem:[#allocation8 + $0x440] sm:$0xff] }
 0x113   : > { %3100 = vmatprep.mubr.f32.mxu0 %v4301_v40  ;;  %3438 = vmatprep.subr.bf16.mxu0 %v3437_v57  ;;  %v1919_v40 = vld [vmem:[#allocation8 + $0x458] sm:$0xff] }
 0x114   : > { %2877 = vmatmul.mubr.f32.gmra.mrb[2].mxu1 %v4233_v39  ;;  %3466 = vmatprep.subr.bf16.mxu1 %v3437_v57  ;;  %v3449_v39 = vpack.c.bf16 %v1917_v36, %v1916_v38 }
 0x115   : > { %3101 = vmatmul.mubr.f32.gmra.mrb[2].mxu0 %v4305_v48  ;;  %3474 = vmatpush3.bf16.msra.mxu1 %v3437_v57  ;;  %v1921_v48 = vld [vmem:[#allocation8 + $0x468] sm:$0xff] }
 0x116   : > { %3440 = vmatpush3.bf16.msra.mxu0 %v3437_v57  ;;  %2879 = vmatprep.mubr.f32.mxu1 %v4239_v43  ;;  %v1918_v43 = vld [vmem:[#allocation8 + $0x450] sm:$0xff] }
 0x117   : > { %3103 = vmatprep.mubr.f32.mxu0 %v4309_v50  ;;  %3442 = vmatprep.subr.bf16.mxu0 %v3441_v56  ;;  %v1923_v50 = vld [vmem:[#allocation8 + $0x478] sm:$0xff] }
 0x118   : > { %2880 = vmatmul.mubr.f32.gmra.mrb[4].mxu1 %v4242_v44  ;;  %3467 = vmatprep.subr.bf16.mxu1 %v3441_v56  ;;  %v3453_v44 = vpack.c.bf16 %v1919_v40, %v1918_v43 }
 0x119   : > { %3104 = vmatmul.mubr.f32.gmra.mrb[4].mxu0 %v4313_v58  ;;  %3475 = vmatpush3.bf16.msra.mxu1 %v3441_v56 }
 0x11a   : > { %3444 = vmatpush3.bf16.msra.mxu0 %v3441_v56  ;;  %2882 = vmatprep.mubr.f32.mxu1 %v4248_v52  ;;  %v1920_v52 = vld [vmem:[#allocation8 + $0x460] sm:$0xff] }
 0x11b   : > { %3106 = vmatprep.mubr.f32.mxu0 %v4317_v60  ;;  %3446 = vmatprep.subr.bf16.mxu0 %v3445_v31 }
 0x11c   : > { %2883 = vmatmul.mubr.f32.gmra.mrb[6].mxu1 %v4253_v55  ;;  %3468 = vmatprep.subr.bf16.mxu1 %v3445_v31  ;;  %v3457_v55 = vpack.c.bf16 %v1921_v48, %v1920_v52 }
 0x11d   : > { %3107 = vmatmul.mubr.f32.gmra.mrb[6].mxu0 %v4321_v4  ;;  %3476 = vmatpush3.bf16.msra.mxu1 %v3445_v31 }
 0x11e   : > { %3448 = vmatpush3.bf16.msra.mxu0 %v3445_v31  ;;  %2885 = vmatprep.mubr.f32.mxu1 %v4260_v61  ;;  %v1922_v61 = vld [vmem:[#allocation8 + $0x470] sm:$0xff] }
 0x11f   : > { %3109 = vmatprep.mubr.f32.mxu0 %v4325_v8  ;;  %3450 = vmatprep.subr.bf16.mxu0 %v3449_v39 }
 0x120   : > { %2886 = vmatmul.mubr.f32.gmra.mrb[8].mxu1 %v4263_v0  ;;  %3469 = vmatprep.subr.bf16.mxu1 %v3449_v39  ;;  %v3461_v0 = vpack.c.bf16 %v1923_v50, %v1922_v61 }
 0x121   : > { %3110 = vmatmul.mubr.f32.gmra.mrb[8].mxu0 %v4329_v16  ;;  %3477 = vmatpush3.bf16.msra.mxu1 %v3449_v39 }
 0x122   : > { %3452 = vmatpush3.bf16.msra.mxu0 %v3449_v39  ;;  %2888 = vmatprep.mubr.f32.mxu1 %v4269_v6  ;;  %v1711_v6 = vld [vmem:[#allocation2 + $0xd9] sm:$0xff] }
 0x123   : > { %3112 = vmatprep.mubr.f32.mxu0 %v4333_v18  ;;  %3454 = vmatprep.subr.bf16.mxu0 %v3453_v44 }
 0x124   : > { %2889 = vmatmul.mubr.f32.gmra.mrb[10].mxu1 %v4272_v7  ;;  %3470 = vmatprep.subr.bf16.mxu1 %v3453_v44  ;;  %v1712_v7 = vld [vmem:[#allocation2 + $0xe1] sm:$0xff] }
 0x125   : > { %3113 = vmatmul.mubr.f32.gmra.mrb[10].mxu0 %v4337_v27  ;;  %3478 = vmatpush3.bf16.msra.mxu1 %v3453_v44 }
 0x126   : > { %3456 = vmatpush3.bf16.msra.mxu0 %v3453_v44  ;;  %2891 = vmatprep.mubr.f32.mxu1 %v4278_v11  ;;  %v1905_v11 = vld [vmem:[#allocation2 + $0xda] sm:$0xff] }
 0x127   : > { %3115 = vmatprep.mubr.f32.mxu0 %v4341_v33  ;;  %3458 = vmatprep.subr.bf16.mxu0 %v3457_v55 }
 0x128   : > { %2892 = vmatmul.mubr.f32.gmra.mrb[12].mxu1 %v4281_v13  ;;  %3471 = vmatprep.subr.bf16.mxu1 %v3457_v55  ;;  %v1906_v13 = vld [vmem:[#allocation2 + $0xe2] sm:$0xff] }
 0x129   : > { %3116 = vmatmul.mubr.f32.gmra.mrb[12].mxu0 %v4345_v45  ;;  %3479 = vmatpush3.bf16.msra.mxu1 %v3457_v55 }
 0x12a   : > { %3460 = vmatpush3.bf16.msra.mxu0 %v3457_v55  ;;  %2894 = vmatprep.mubr.f32.mxu1 %v4287_v19 }
 0x12b   : > { %3118 = vmatprep.mubr.f32.mxu0 %v1711_v6  ;;  %3462 = vmatprep.subr.bf16.mxu0 %v3461_v0 }
 0x12c   : > { %2895 = vmatmul.mubr.f32.gmra.mrb[14].mxu1 %v4290_v22  ;;  %3472 = vmatprep.subr.bf16.mxu1 %v3461_v0 }
 0x12d   : > { %3119 = vmatmul.mubr.f32.gmra.mrb[14].mxu0 %v1712_v7  ;;  %3480 = vmatpush3.bf16.msra.mxu1 %v3461_v0 }
 0x12e   : > { %3464 = vmatpush3.bf16.msra.mxu0 %v3461_v0  ;;  %3153 = vmatprep.mubr.f32.mxu0 %v4365_v1 }
 0x12f   : > { %3165 = vmatprep.mubr.f32.mxu1 %v4398_v9 }
 0x130   : > { %3166 = vmatmul.mubr.f32.vlgmr.msra.gmra.mrb[16].mxu1 %v4402_v20 }
 0x131   : > { %3154 = vmatmul.mubr.f32.vlgmr.msra.gmra.mrb[0].mxu0 %v4369_v10  ;;  %3168 = vmatprep.mubr.f32.mxu1 %v4406_v23 }
 0x132   : > { %3156 = vmatprep.mubr.f32.mxu0 %v4374_v14 }
 0x134   : > { %3169 = vmatmul.mubr.f32.gmra.mrb[18].mxu1 %v4410_v42 }
 0x135   : > { %3157 = vmatmul.mubr.f32.gmra.mrb[2].mxu0 %v4378_v24  ;;  %3171 = vmatprep.mubr.f32.mxu1 %v4414_v54 }
 0x136   : > { %3159 = vmatprep.mubr.f32.mxu0 %v4382_v32 }
 0x138   : > { %3172 = vmatmul.mubr.f32.gmra.mrb[20].mxu1 %v4418_v28 }
 0x139   : > { %3160 = vmatmul.mubr.f32.gmra.mrb[4].mxu0 %v4386_v47  ;;  %3174 = vmatprep.mubr.f32.mxu1 %v1905_v11 }
 0x13a   : > { %3162 = vmatprep.mubr.f32.mxu0 %v4390_v53 }
 0x13c   : > { %3175 = vmatmul.mubr.f32.gmra.mrb[22].mxu1 %v1906_v13 }
 0x13d   : > { %3163 = vmatmul.mubr.f32.gmra.mrb[6].mxu0 %v4394_v3 }
 0x1e3   : > { %v2875_v19 = vpop.f32.mrb[0].mxu1 }
 0x1e4   : > { %v1019_v22 = vpop.f32.mrb[1].mxu1 }
 0x1e7   : > { %v2878_v58 = vpop.f32.mrb[2].mxu1 }
 0x1e8   : > { %v1029_v60 = vpop.f32.mrb[3].mxu1 }
 0x1eb   : > { %v4497_v4 = vpop.f32.mrb[4].mxu1 }
 0x1ec   : > { %v4499_v8 = vpop.f32.mrb[5].mxu1 }
 0x1ef   : > { %v4501_v16 = vpop.f32.mrb[6].mxu1 }
 0x1f0   : > { %v4503_v18 = vpop.f32.mrb[7].mxu1 }
 0x1f3   : > { %v2887_v27 = vpop.f32.mrb[8].mxu1 }
 0x1f4   : > { %v3111_v33 = vpop.f32.mrb[8].mxu0  ;;  %v1059_v45 = vpop.f32.mrb[9].mxu1 }
 0x1f5   : > { %v3489_v1 = vadd.f32 %v3111_v33, %v2887_v27  ;;  %v1836_v10 = vpop.f32.mrb[9].mxu0 }
 0x1f6   : > { %v3491_v14 = vadd.f32 %v1836_v10, %v1059_v45 }
 0x1f7   : > { %v2890_v24 = vpop.f32.mrb[10].mxu1 }
 0x1f8   : > { %v3114_v32 = vpop.f32.mrb[10].mxu0  ;;  %v1069_v47 = vpop.f32.mrb[11].mxu1 }
 0x1f9   : > { %v3493_v53 = vadd.f32 %v3114_v32, %v2890_v24  ;;  %v1846_v3 = vpop.f32.mrb[11].mxu0 }
 0x1fa   : > { %v3495_v9 = vadd.f32 %v1846_v3, %v1069_v47 }
 0x1fb   : > { %v2893_v20 = vpop.f32.mrb[12].mxu1 }
 0x1fc   : > { %v3117_v23 = vpop.f32.mrb[12].mxu0  ;;  %v1079_v42 = vpop.f32.mrb[13].mxu1 }
 0x1fd   : > { %v3497_v54 = vadd.f32 %v3117_v23, %v2893_v20  ;;  %v1856_v28 = vpop.f32.mrb[13].mxu0 }
 0x1fe   : > { %v3499_v17 = vadd.f32 %v1856_v28, %v1079_v42 }
 0x1ff   : > { %v2896_v34 = vpop.f32.mrb[14].mxu1 }
 0x200   : > { %v3120_v29 = vpop.f32.mrb[14].mxu0  ;;  %v1089_v46 = vpop.f32.mrb[15].mxu1 }
 0x201   : > { %v3501_v62 = vadd.f32 %v3120_v29, %v2896_v34  ;;  %v1866_v15 = vpop.f32.mrb[15].mxu0 }
 0x202   : > { %v3503_v21 = vadd.f32 %v1866_v15, %v1089_v46 }
 0x203   : > { %v3167_v25 = vpop.f32.mrb[16].mxu1 }
 0x204   : > { %v3155_v35 = vpop.f32.mrb[0].mxu0  ;;  %v4506_v37 = vadd.f32 %v3489_v1, %v3167_v25  ;;  %v2030_v41 = vpop.f32.mrb[17].mxu1 }
 0x205   : > { %v3481_v59 = vadd.f32 %v3155_v35, %v2875_v19  ;;  %v1990_v63 = vpop.f32.mrb[1].mxu0  ;;  %v4508_v2 = vadd.f32 %v3491_v14, %v2030_v41 }
 0x206   : > { %2094 = vst [vmem:[%s4510_s25 + $0x48] sm:$0xff] %v4506_v37  ;;  %v3482_v5 = vadd.f32 %v1990_v63, %v1019_v22 }
 0x207   : > { %2086 = vst [vmem:[%s4510_s25 + $0x8] sm:$0xff] %v3481_v59  ;;  %v2123_v51 = vmul.f32 %v3481_v59, %v3481_v59  ;;  %2093 = vst [vmem:[%s4510_s25 + $0x40] sm:$0xff] %v4508_v2  ;;  %v3170_v57 = vpop.f32.mrb[18].mxu1 }
 0x208   : > { %2085 = vst [vmem:[%s4510_s25] sm:$0xff] %v3482_v5  ;;  %v2101_v49 = vadd.f32 %v3482_v5, %v3481_v59  ;;  %v2122_v12 = vmul.f32 %v3482_v5, %v3482_v5  ;;  %v3158_v56 = vpop.f32.mrb[2].mxu0  ;;  %v4518_v30 = vadd.f32 %v3493_v53, %v3170_v57  ;;  %v2040_v26 = vpop.f32.mrb[19].mxu1 }
 0x209   : > { %v3483_v31 = vadd.f32 %v3158_v56, %v2878_v58  ;;  %v2000_v38 = vpop.f32.mrb[3].mxu0  ;;  %v4520_v36 = vadd.f32 %v3495_v9, %v2040_v26 }
 0x20a   : > { %v2138_v39 = vadd.f32 %v2123_v51, %v2122_v12  ;;  %2096 = vst [vmem:[%s4510_s25 + $0x58] sm:$0xff] %v4518_v30  ;;  %v3484_v43 = vadd.f32 %v2000_v38, %v1029_v60 }
 0x20b   : > { %2088 = vst [vmem:[%s4510_s25 + $0x18] sm:$0xff] %v3483_v31  ;;  %2095 = vst [vmem:[%s4510_s25 + $0x50] sm:$0xff] %v4520_v36  ;;  %v3173_v40 = vpop.f32.mrb[20].mxu1  ;;  %v2125_v7 = vmul.f32 %v3483_v31, %v3483_v31 }
 0x20c   : > { %2087 = vst [vmem:[%s4510_s25 + $0x10] sm:$0xff] %v3484_v43  ;;  %v2102_v44 = vadd.f32 %v3484_v43, %v2101_v49  ;;  %v2124_v52 = vmul.f32 %v3484_v43, %v3484_v43  ;;  %v3161_v48 = vpop.f32.mrb[4].mxu0  ;;  %v4530_v55 = vadd.f32 %v3497_v54, %v3173_v40  ;;  %v2050_v61 = vpop.f32.mrb[21].mxu1 }
 0x20d   : > { %v3485_v50 = vadd.f32 %v3161_v48, %v4497_v4  ;;  %v2010_v0 = vpop.f32.mrb[5].mxu0  ;;  %v4535_v6 = vadd.f32 %v3499_v17, %v2050_v61 }
 0x20e   : > { %v2139_v11 = vadd.f32 %v2138_v39, %v2124_v52  ;;  %2098 = vst [vmem:[%s4510_s25 + $0x68] sm:$0xff] %v4530_v55  ;;  %v3486_v13 = vadd.f32 %v2010_v0, %v4499_v8  ;;  %v2103_v19 = vadd.f32 %v3483_v31, %v2102_v44 }
 0x20f   : > { %2090 = vst [vmem:[%s4510_s25 + $0x28] sm:$0xff] %v3485_v50  ;;  %2097 = vst [vmem:[%s4510_s25 + $0x60] sm:$0xff] %v4535_v6  ;;  %v3176_v22 = vpop.f32.mrb[22].mxu1  ;;  %v2127_v14 = vmul.f32 %v3485_v50, %v3485_v50 }
 0x210   : > { %2089 = vst [vmem:[%s4510_s25 + $0x20] sm:$0xff] %v3486_v13  ;;  %v2104_v58 = vadd.f32 %v3486_v13, %v2103_v19  ;;  %v2126_v60 = vmul.f32 %v3486_v13, %v3486_v13  ;;  %v2140_v4 = vadd.f32 %v2139_v11, %v2125_v7  ;;  %v3164_v27 = vpop.f32.mrb[6].mxu0  ;;  %v4546_v33 = vadd.f32 %v3501_v62, %v3176_v22  ;;  %v2060_v45 = vpop.f32.mrb[23].mxu1 }
 0x211   : > { %v3487_v8 = vadd.f32 %v3164_v27, %v4501_v16  ;;  %v2020_v1 = vpop.f32.mrb[7].mxu0  ;;  %v4549_v10 = vadd.f32 %v3503_v21, %v2060_v45 }
 0x212   : > { %v2141_v24 = vadd.f32 %v2140_v4, %v2126_v60  ;;  %2100 = vst [vmem:[%s4510_s25 + $0x78] sm:$0xff] %v4546_v33  ;;  %v3488_v32 = vadd.f32 %v2020_v1, %v4503_v18  ;;  %v2105_v47 = vadd.f32 %v3485_v50, %v2104_v58 }
 0x213   : > { %2092 = vst [vmem:[%s4510_s25 + $0x38] sm:$0xff] %v3487_v8  ;;  %2099 = vst [vmem:[%s4510_s25 + $0x70] sm:$0xff] %v4549_v10 }
 0x214   : > { %2091 = vst [vmem:[%s4510_s25 + $0x30] sm:$0xff] %v3488_v32  ;;  %v2106_v16 = vadd.f32 %v3488_v32, %v2105_v47  ;;  %v2128_v53 = vmul.f32 %v3488_v32, %v3488_v32  ;;  %v2142_v3 = vadd.f32 %v2141_v24, %v2127_v14 }
 0x215   : > { %3821 = shalt.err (!%p3818_p10)
}
 0x216   : > { %s3822_s30 = scalar_lea.hbm %s4559_s13, 2048  ;;  %s3826_s28 = scalar_lea.hbm %s4676_s3, 8192 }
 0x217   : > { %p3823_p12 = scmp.ne.s32.totalorder %s4559_s13, %s3822_s30  ;;  %p3827_p8 = scmp.lt.u32.totalorder %s4559_s13, %s4676_s3 }
 0x218   : > { %p3828_p0 = scmp.lt.u32.totalorder %s3826_s28, %s3822_s30  ;;  %p3830_p7 = scmp.lt.u32.totalorder %s3822_s30, %s4559_s13 }
 0x219   : > { %p3824_p13 = pnand %p3823_p12, %p4086_p11 }
 0x21a   : > { %p3829_p3 = por %p3828_p0, %p3827_p8 }
 0x21b   : > { %p3825_p5 = pneg %p3824_p13 }
 0x21c   : > { %p3831_p1 = por %p3830_p7, %p3829_p3 }
 0x21e   : > { %p3832_p2 = pnand %p3831_p1, %p3825_p5 }
 0x220   : > { %3835 = shalt.err (!%p3832_p2)
}
 0x221   : > { %s3954_s25 = smov 128   ;;  %s3955_s2 = smov 8   ;;  %v2129_v18 = vmul.f32 %v3487_v8, %v3487_v8  ;;  %v2107_v9 = vadd.f32 %v3487_v8, %v2106_v16  ;;  %v2143_v20 = vadd.f32 %v2142_v3, %v2128_v53  ;;  %v2130_v23 = vmul.f32 %v4508_v2, %v4508_v2 }
 0x222   : > { %3625 = dma.vmem_to_hbm [thread:$0]  (%p4086_p11), %s4551_s10, 2048, %s4559_s13, %s2163_s14, %s3954_s25, %s3954_s25, %s3955_s2   ;;  %v2131_v28 = vmul.f32 %v4506_v37, %v4506_v37  ;;  %v2132_v29 = vmul.f32 %v4520_v36, %v4520_v36  ;;  %v2133_v15 = vmul.f32 %v4518_v30, %v4518_v30  ;;  %v2134_v35 = vmul.f32 %v4535_v6, %v4535_v6 }
 0x223   : > { %v2108_v42 = vadd.f32 %v4508_v2, %v2107_v9  ;;  %v2144_v54 = vadd.f32 %v2143_v20, %v2129_v18  ;;  %v2136_v51 = vmul.f32 %v4549_v10, %v4549_v10  ;;  %v2137_v49 = vmul.f32 %v4546_v33, %v4546_v33  ;;  %s2370_s9 = sshll.u32 %s4189_s12, 1  ;;  %s2380_s5 = sshll.u32 %s3934_s19, 1 }
 0x224   : > { %s2198_s10 = sadd.s32 %s3930_s18, %s2380_s5  ;;  %s305_s15 = scalar_lea.vmem [#allocation10], %s2370_s9  ;;  %vm2159_vm0 = vcmask 1040384  }
 0x225   : > { %v2109_v17 = vadd.f32 %v4506_v37, %v2108_v42  ;;  %v2145_v34 = vadd.f32 %v2144_v54, %v2130_v23  ;;  %v2135_v37 = vmul.f32 %v4530_v55, %v4530_v55  ;;  %s2381_s7 = sshll.u32 %s2198_s10, 5  ;;  %s2202_s0 = sshll.u32 %s305_s15, 4  ;;  %s4621_s0 = int_to_ptr.vmem [resolvable:$true] %s2202_s0 }
 0x226   : > { %s4619_s26 = scalar_lea.hbm %s4677_s4, %s2381_s7  ;;  %s2168_s18 = scalar_lea.sflag [#allocation11], %s4189_s12 }
 0x227   : > { %v2146_v46 = vadd.f32 %v2145_v34, %v2131_v28  ;;  %v2110_v62 = vadd.f32 %v4520_v36, %v2109_v17  ;;  %s3836_s19 = scalar_lea.vmem %s4621_s0, 32  ;;  %s3956_s6 = smov [#allocation10]  }
 0x228   : > { %p3837_p4 = scmp.ne.s32.totalorder %s4621_s0, %s3836_s19  ;;  %s3840_s24 = sshll.u32 %s3956_s6, 4  ;;  %s3841_s24 = int_to_ptr.vmem [resolvable:$false] %s3840_s24 }
 0x229   : > { %v2111_v21 = vadd.f32 %v4518_v30, %v2110_v62  ;;  %v2147_v25 = vadd.f32 %v2146_v46, %v2132_v29  ;;  %s3842_s29 = scalar_lea.vmem %s3841_s24, 64  ;;  %p3843_p10 = scmp.lt.s32.totalorder %s4621_s0, %s3841_s24 }
 0x22a   : > { %p3838_p9 = pnand %p3837_p4, %p4086_p11  ;;  %p3844_p12 = scmp.lt.s32.totalorder %s3842_s29, %s3836_s19 }
 0x22b   : > { %v2112_v41 = vadd.f32 %v4535_v6, %v2111_v21  ;;  %v2148_v59 = vadd.f32 %v2147_v25, %v2133_v15 }
 0x22c   : > { %p3839_p6 = pneg %p3838_p9  ;;  %p3845_p13 = por %p3844_p12, %p3843_p10 }
 0x22d   : > { %v2113_v63 = vadd.f32 %v4530_v55, %v2112_v41  ;;  %v2149_v2 = vadd.f32 %v2148_v59, %v2134_v35 }
 0x22e   : > { %p3846_p5 = pnand %p3845_p13, %p3839_p6 }
 0x22f   : > { %v2114_v5 = vadd.f32 %v4549_v10, %v2113_v63  ;;  %v2150_v57 = vadd.f32 %v2149_v2, %v2135_v37 }
 0x231   : > { %v2115_v12 = vadd.f32 %v4546_v33, %v2114_v5  ;;  %v2151_v56 = vadd.f32 %v2150_v57, %v2136_v51 }
 0x233   : > { %v2116_v30 = vrot.slane %v2115_v12, 4  ;;  %v2152_v26 = vadd.f32 %v2151_v56, %v2137_v49 }
 0x235   : > { %v2117_v31 = vadd.f32 %v2116_v30, %v2115_v12  ;;  %v2153_v38 = vrot.slane %v2152_v26, 4 }
 0x237   : > { %v2118_v36 = vrot.slane %v2117_v31, 2  ;;  %v2154_v39 = vadd.f32 %v2153_v38, %v2152_v26 }
 0x239   : > { %v2119_v43 = vadd.f32 %v2118_v36, %v2117_v31  ;;  %v2155_v40 = vrot.slane %v2154_v39, 2 }
 0x23b   : > { %v2120_v44 = vrot.slane %v2119_v43, 1  ;;  %v2156_v52 = vadd.f32 %v2155_v40, %v2154_v39 }
 0x23d   : > { %v2157_v48 = vrot.slane %v2156_v52, 1  ;;  %v2121_v55 = vadd.f32 %v2120_v44, %v2119_v43 }
 0x23f   : > { %v2158_v61 = vadd.f32 %v2157_v48, %v2156_v52 }
 0x241   : > { %v2160_v50 = vsel %vm2159_vm0, %v2121_v55, %v2158_v61 }
 0x242   : > { %2161 = vst [vmem:[%s305_s15] sm:$0x3] %v2160_v50 }
 0x243   : > { %3849 = shalt.err (!%p3846_p5)
}
 0x244   : > { %s3850_s12 = scalar_lea.hbm %s4619_s26, 32  ;;  %s3854_s27 = scalar_lea.hbm %s4677_s4, 128 }
 0x245   : > { %p3851_p8 = scmp.ne.s32.totalorder %s4619_s26, %s3850_s12  ;;  %p3855_p7 = scmp.lt.u32.totalorder %s4619_s26, %s4677_s4 }
 0x246   : > { %p3856_p1 = scmp.lt.u32.totalorder %s3854_s27, %s3850_s12  ;;  %p3858_p4 = scmp.lt.u32.totalorder %s3850_s12, %s4619_s26 }
 0x247   : > { %p3852_p0 = pnand %p3851_p8, %p4086_p11 }
 0x248   : > { %p3857_p2 = por %p3856_p1, %p3855_p7 }
 0x249   : > { %p3853_p3 = pneg %p3852_p0 }
 0x24a   : > { %p3859_p9 = por %p3858_p4, %p3857_p2 }
 0x24c   : > { %p3860_p6 = pnand %p3859_p9, %p3853_p3 }
 0x24e   : > { %3863 = shalt.err (!%p3860_p6)
}
 0x24f   : > { %3626 = dma.vmem_to_hbm [thread:$0]  (%p4086_p11), %s4621_s0, 32, %s4619_s26, %s2168_s18  }
 0x250 PF: > { %s4713_s23 = sld [smem:[#allocation17_spill]]  ;;  %s4714_s25 = sld [smem:[#allocation19_spill]] }
 0x251   : > { %p3650_p10 = scmp.ge.s32.totalorder %s3946_s22, 2 }
 0x256   : > { %s2214_s2 = sand.u32 1, %s4713_s23   ;;  %p4715_p12 = scmp.ne.s32.totalorder %s4714_s25, 0 }
 0x257   : > { %s2215_s9 = scalar_lea.sflag [#allocation5], %s2214_s2 }
 0x258   : > { %p3641_p13 = pnand %p3650_p10, %p4715_p12 }
 0x25a   : > { %3909 = dma.done.wait (!%p3641_p13), %s2215_s9, 2048  }
 0x25b   : > { %3911 = vsyncadd (!%p3641_p13), %s2215_s9, 4294965248  ;;  %s2224_s5 = scalar_lea.sflag [#allocation11], %s2214_s2 }
 0x25c   : > { %3913 = dma.done.wait (!%p3641_p13), %s2224_s5, 32  }
 0x25d   : > { %3915 = vsyncadd (!%p3641_p13), %s2224_s5, 4294967264  ;;  %s27_s22 = sadd.s32 1, %s3946_s22   ;;  %s4716_s8 = sld [smem:[#allocation18_spill]] }
 0x25e   : > { %p24_p5 = scmp.ge.s32.totalorder %s27_s22, 6   ;;  %s4717_s17 = sld [smem:[#allocation22_spill]] }
 0x25f   : > { %s4718_s10 = sld [smem:[#allocation20_spill]]  ;;  %s4719_s7 = sld [smem:[#allocation21_spill]] }
 0x260   : > { %s4720_s15 = smov %s3922_s16  ;;  %s4722_s18 = smov %s3938_s20 }
 0x261   : > { %s4723_s19 = smov %s3942_s21  ;;  %26 = sbr.rel (!%p24_p5) target bundleno = 14 (0xe), region = 123 }
 0x263   : > { %s4721_s16 = smov %s4716_s8 }
 0x265   : > { %s4724_s20 = smov %s4718_s10  ;;  %s4725_s21 = smov %s4719_s7 }
 0x268   :  { %2229 = vsyncpa [#allocation4], 1 }
 0x269   :  { %2231 = vsyncpa [#allocation4 + $0x1], 1 }
 0x26a   :  { %2232 = vsyncpa [#allocation7], 1 }
 0x26b   :  { %2234 = vsyncpa [#allocation7 + $0x1], 1 }
 0x26c   :  { %2235 = vsyncpa [#allocation5], 1 }
 0x26d   :  { %2237 = vsyncpa [#allocation5 + $0x1], 1 }
 0x26e   :  { %2238 = vsyncpa [#allocation11], 1 }
 0x26f   :  { %2240 = vsyncpa [#allocation11 + $0x1], 1 }

</bundles_post_ra>
